<compile_context>
chip_gen: v7x
topology: tpu7x:2x2x1
jax: 0.10.0
libtpu: 0.0.40
codegen_flags: <defaults>
</compile_context>

<pallas_src>
import jax
import jax.numpy as jnp
import numpy as np
from jax.experimental import pallas as pl
from jax.experimental.pallas import tpu as pltpu


# --------------------------------------------------------------------------
# tile pickers (trivial at the demo shapes; keep bigger shapes inside VMEM)
# --------------------------------------------------------------------------
def _pick_channel_tile(C, H, W, budget_bytes=4 << 20):
    """Channel tile for the stats kernel: multiple of 8 (or C) dividing C."""
    if C * H * W * 4 <= budget_bytes:
        return C
    max_c = max(8, (budget_bytes // (H * W * 4)) // 8 * 8)
    for c in range(min(C // 8 * 8, max_c), 7, -8):
        if C % c == 0:
            return c
    return C


def _pick_spatial_tile(HW, C, budget_bytes=2 << 20):
    """Spatial tile for the apply kernel: multiple of 128 (or HW) dividing HW."""
    if C * HW * 4 <= budget_bytes:
        return HW
    max_sp = max(128, (budget_bytes // (C * 4)) // 128 * 128)
    for sp in range(max_sp, 127, -128):
        if HW % sp == 0:
            return sp
    return HW


# --------------------------------------------------------------------------
# kernel 1: pooling pyramid + per-channel fusion Linear(21 -> 1)
# --------------------------------------------------------------------------
def _spse_stats_kernel(x_ref, fw_ref, fb_ref, fused_ref):
    x = x_ref[0]                                   # (ct, H, W)
    ct, H, W = x.shape
    bh, bw = H // 4, W // 4

    # H reduction first: only 4 cross-sublane reductions -> row bands (ct, W).
    bands = [jnp.max(x[:, i * bh:(i + 1) * bh, :], axis=1) for i in range(4)]

    # rate-4 pool: 4x4 grid of W-segment maxima, row-major (matches p3.view).
    p3 = [jnp.max(bands[i][:, j * bw:(j + 1) * bw], axis=1, keepdims=True)
          for i in range(4) for j in range(4)]                     # 16 x (ct, 1)

    # rate-2 pool from 2x2 groups of rate-4 blocks, row-major (matches p2.view).
    p2 = [jnp.maximum(
              jnp.maximum(p3[(2 * i) * 4 + 2 * j], p3[(2 * i) * 4 + 2 * j + 1]),
              jnp.maximum(p3[(2 * i + 1) * 4 + 2 * j], p3[(2 * i + 1) * 4 + 2 * j + 1]))
          for i in range(2) for j in range(2)]                     # 4 x (ct, 1)

    # rate-1 (global) pool.
    p1 = jnp.maximum(jnp.maximum(p2[0], p2[1]), jnp.maximum(p2[2], p2[3]))

    # ordering matches torch.cat((p1.view, p2.view, p3.view), dim=2)
    pools = [p1] + p2 + p3                                         # 21 x (ct, 1)

    # per-channel fusion Linear(21 -> 1): fused[c] = sum_k fw[c,k]*p[c,k] + fb[c]
    fw = fw_ref[...]                               # (ct, 21)
    acc = fb_ref[...]                              # (ct, 1)
    for k in range(21):
        acc = acc + fw[:, k:k + 1] * pools[k]
    fused_ref[0] = acc.astype(fused_ref.dtype)


# --------------------------------------------------------------------------
# kernel 2: lane-dense streaming rescale  out = x * scale[:, :, None]
# --------------------------------------------------------------------------
def _spse_apply_kernel(x_ref, s_ref, o_ref):
    # x_ref: (1, C, sp)  s_ref: (1, C, 1) -> lane broadcast; unmasked stores
    # because sp is a large multiple of 128 (or the full H*W extent).
    o_ref[...] = (x_ref[...] * s_ref[...]).astype(o_ref.dtype)


# --------------------------------------------------------------------------
# public wrapper (NCHW in, NCHW out -- no transposes anywhere)
# --------------------------------------------------------------------------
def spse_forward(x_nchw, params):
    fw, fb, w1, b1, w2, b2 = (params[k] for k in ("fw", "fb", "w1", "b1", "w2", "b2"))
    B, C, H, W = x_nchw.shape
    assert H % 4 == 0 and W % 4 == 0, "SPSE kernel expects H, W divisible by 4"

    # ---- pass 1: pooling pyramid + fusion -> fused (B, C, 1) ----
    cst = _pick_channel_tile(C, H, W)
    fused = pl.pallas_call(
        _spse_stats_kernel,
        out_shape=jax.ShapeDtypeStruct((B, C, 1), jnp.float32),
        grid_spec=pltpu.PrefetchScalarGridSpec(
            num_scalar_prefetch=0,
            grid=(B, C // cst),
            in_specs=[
                pl.BlockSpec((1, cst, H, W), lambda b, c: (b, c, 0, 0)),
                pl.BlockSpec((cst, 21), lambda b, c: (c, 0)),
                pl.BlockSpec((cst, 1), lambda b, c: (c, 0)),
            ],
            out_specs=pl.BlockSpec((1, cst, 1), lambda b, c: (b, c, 0)),
        ),
        compiler_params=pltpu.CompilerParams(
            dimension_semantics=("parallel", "parallel")),
    )(x_nchw, fw.astype(jnp.float32), fb.reshape(C, 1).astype(jnp.float32))

    # ---- pass 2 (tiny): squeeze-excite MLP, batched over B in plain XLA ----
    fused2d = fused[:, :, 0]                               # (B, C)
    h = jnp.maximum(fused2d @ w1.T + b1[None, :], 0.0)     # (B, C//red)
    scale = h @ w2.T + b2[None, :]                         # (B, C); no sigmoid in forward()
    scale = scale.astype(x_nchw.dtype).reshape(B, C, 1)

    # ---- pass 3: lane-dense streaming rescale on (B, C, H*W) ----
    HW = H * W
    sp = _pick_spatial_tile(HW, C)
    x_flat = x_nchw.reshape(B, C, HW)                      # free: contiguous NCHW view
    out_flat = pl.pallas_call(
        _spse_apply_kernel,
        out_shape=jax.ShapeDtypeStruct((B, C, HW), x_nchw.dtype),
        grid_spec=pltpu.PrefetchScalarGridSpec(
            num_scalar_prefetch=0,
            grid=(B, HW // sp),
            in_specs=[
                pl.BlockSpec((1, C, sp), lambda b, s: (b, 0, s)),
                pl.BlockSpec((1, C, 1), lambda b, s: (b, 0, 0)),
            ],
            out_specs=pl.BlockSpec((1, C, sp), lambda b, s: (b, 0, s)),
        ),
        compiler_params=pltpu.CompilerParams(
            dimension_semantics=("parallel", "parallel"),
            vmem_limit_bytes=48 * 1024 * 1024),
        # TODO(synk): add input_output_aliases={0: 0} when the caller allows
        # clobbering x (saves one HBM allocation; semantics unchanged).
    )(x_flat, scale)

    return out_flat.reshape(B, C, H, W)


# --------------------------------------------------------------------------
# pure-JAX reference (mirrors the PyTorch forward) for correctness check
# --------------------------------------------------------------------------
def spse_reference(x, params):
    fw, fb, w1, b1, w2, b2 = (params[k] for k in ("fw", "fb", "w1", "b1", "w2", "b2"))
    B, C, H, W = x.shape

    def pool(r):
        kh, kw = H // r, W // r
        xr = x.reshape(B, C, r, kh, r, kw)
        return jnp.max(xr, axis=(3, 5)).reshape(B, C, r * r)

    p = jnp.concatenate([pool(1), pool(2), pool(4)], axis=2)     # (B, C, 21)
    fused = jnp.einsum("bck,ck->bc", p, fw) + fb                 # (B, C)
    h = jax.nn.relu(fused @ w1.T + b1)
    y = h @ w2.T + b2
    return x * y[:, :, None, None]


if __name__ == "__main__":
    B, C, H, W = 2, 32, 16, 16
    reduction = 16
    Cr = int(C // reduction)

    key = jax.random.PRNGKey(0)
    ks = jax.random.split(key, 7)
    x = jax.random.normal(ks[0], (B, C, H, W), jnp.float32)
    params = {
        "fw": 0.1 * jax.random.normal(ks[1], (C, 21), jnp.float32),   # fusion weights
        "fb": 0.1 * jax.random.normal(ks[2], (C,), jnp.float32),      # fusion biases
        "w1": 0.1 * jax.random.normal(ks[3], (Cr, C), jnp.float32),   # fc[0]
        "b1": 0.1 * jax.random.normal(ks[4], (Cr,), jnp.float32),
        "w2": 0.1 * jax.random.normal(ks[5], (C, Cr), jnp.float32),   # fc[2]
        "b2": 0.1 * jax.random.normal(ks[6], (C,), jnp.float32),
    }

    out = spse_forward(x, params)
    out = jax.block_until_ready(out)

    ref = spse_reference(x, params)
    np.testing.assert_allclose(np.asarray(out), np.asarray(ref), rtol=1e-5, atol=1e-5)

    print("KERNEL_OK")
</pallas_src>

<mosaic_0001>
module attributes {stable_mosaic.version = 11 : i64} {
  func.func @_spse_stats_kernel(%arg0: i32, %arg1: i32, %arg2: memref<1x32x16x16xf32, #tpu.memory_space<vmem>>, %arg3: memref<32x21xf32, #tpu.memory_space<vmem>>, %arg4: memref<32x1xf32, #tpu.memory_space<vmem>>, %arg5: memref<1x32x1xf32, #tpu.memory_space<vmem>>) attributes {dimension_semantics = [#tpu.dimension_semantics<parallel>, #tpu.dimension_semantics<parallel>], iteration_bounds = array<i64: 2, 1>, scalar_prefetch = 0 : i64, scratch_operands = 0 : i64, tpu.core_type = #tpu.core_type<tc>, window_params = [{transform_indices = @transform_0, window_bounds = array<i64: 1, 32, 16, 16>}, {transform_indices = @transform_1, window_bounds = array<i64: 32, 21>}, {transform_indices = @transform_2, window_bounds = array<i64: 32, 1>}, {transform_indices = @transform_3, window_bounds = array<i64: 1, 32, 1>}]} {
    %c0 = arith.constant 0 : index
    %c0_0 = arith.constant 0 : index
    %c0_1 = arith.constant 0 : index
    %c0_2 = arith.constant 0 : index
    %0 = vector.load %arg2[%c0, %c0_0, %c0_1, %c0_2] : memref<1x32x16x16xf32, #tpu.memory_space<vmem>>, vector<1x32x16x16xf32>
    %1 = vector.shape_cast %0 : vector<1x32x16x16xf32> to vector<32x16x16xf32>
    %2 = vector.extract_strided_slice %1 {offsets = [0, 0, 0], sizes = [32, 4, 16], strides = [1, 1, 1]} : vector<32x16x16xf32> to vector<32x4x16xf32>
    %cst = arith.constant dense<0xFF800000> : vector<32x16xf32>
    %3 = vector.multi_reduction <maximumf>, %2, %cst [1] : vector<32x4x16xf32> to vector<32x16xf32>
    %4 = vector.extract_strided_slice %1 {offsets = [0, 4, 0], sizes = [32, 4, 16], strides = [1, 1, 1]} : vector<32x16x16xf32> to vector<32x4x16xf32>
    %cst_3 = arith.constant dense<0xFF800000> : vector<32x16xf32>
    %5 = vector.multi_reduction <maximumf>, %4, %cst_3 [1] : vector<32x4x16xf32> to vector<32x16xf32>
    %6 = vector.extract_strided_slice %1 {offsets = [0, 8, 0], sizes = [32, 4, 16], strides = [1, 1, 1]} : vector<32x16x16xf32> to vector<32x4x16xf32>
    %cst_4 = arith.constant dense<0xFF800000> : vector<32x16xf32>
    %7 = vector.multi_reduction <maximumf>, %6, %cst_4 [1] : vector<32x4x16xf32> to vector<32x16xf32>
    %8 = vector.extract_strided_slice %1 {offsets = [0, 12, 0], sizes = [32, 4, 16], strides = [1, 1, 1]} : vector<32x16x16xf32> to vector<32x4x16xf32>
    %cst_5 = arith.constant dense<0xFF800000> : vector<32x16xf32>
    %9 = vector.multi_reduction <maximumf>, %8, %cst_5 [1] : vector<32x4x16xf32> to vector<32x16xf32>
    %10 = vector.extract_strided_slice %3 {offsets = [0, 0], sizes = [32, 4], strides = [1, 1]} : vector<32x16xf32> to vector<32x4xf32>
    %cst_6 = arith.constant dense<0xFF800000> : vector<32xf32>
    %11 = vector.multi_reduction <maximumf>, %10, %cst_6 [1] : vector<32x4xf32> to vector<32xf32>
    %12 = vector.shape_cast %11 : vector<32xf32> to vector<32x1xf32>
    %13 = vector.extract_strided_slice %3 {offsets = [0, 4], sizes = [32, 4], strides = [1, 1]} : vector<32x16xf32> to vector<32x4xf32>
    %cst_7 = arith.constant dense<0xFF800000> : vector<32xf32>
    %14 = vector.multi_reduction <maximumf>, %13, %cst_7 [1] : vector<32x4xf32> to vector<32xf32>
    %15 = vector.shape_cast %14 : vector<32xf32> to vector<32x1xf32>
    %16 = vector.extract_strided_slice %3 {offsets = [0, 8], sizes = [32, 4], strides = [1, 1]} : vector<32x16xf32> to vector<32x4xf32>
    %cst_8 = arith.constant dense<0xFF800000> : vector<32xf32>
    %17 = vector.multi_reduction <maximumf>, %16, %cst_8 [1] : vector<32x4xf32> to vector<32xf32>
    %18 = vector.shape_cast %17 : vector<32xf32> to vector<32x1xf32>
    %19 = vector.extract_strided_slice %3 {offsets = [0, 12], sizes = [32, 4], strides = [1, 1]} : vector<32x16xf32> to vector<32x4xf32>
    %cst_9 = arith.constant dense<0xFF800000> : vector<32xf32>
    %20 = vector.multi_reduction <maximumf>, %19, %cst_9 [1] : vector<32x4xf32> to vector<32xf32>
    %21 = vector.shape_cast %20 : vector<32xf32> to vector<32x1xf32>
    %22 = vector.extract_strided_slice %5 {offsets = [0, 0], sizes = [32, 4], strides = [1, 1]} : vector<32x16xf32> to vector<32x4xf32>
    %cst_10 = arith.constant dense<0xFF800000> : vector<32xf32>
    %23 = vector.multi_reduction <maximumf>, %22, %cst_10 [1] : vector<32x4xf32> to vector<32xf32>
    %24 = vector.shape_cast %23 : vector<32xf32> to vector<32x1xf32>
    %25 = vector.extract_strided_slice %5 {offsets = [0, 4], sizes = [32, 4], strides = [1, 1]} : vector<32x16xf32> to vector<32x4xf32>
    %cst_11 = arith.constant dense<0xFF800000> : vector<32xf32>
    %26 = vector.multi_reduction <maximumf>, %25, %cst_11 [1] : vector<32x4xf32> to vector<32xf32>
    %27 = vector.shape_cast %26 : vector<32xf32> to vector<32x1xf32>
    %28 = vector.extract_strided_slice %5 {offsets = [0, 8], sizes = [32, 4], strides = [1, 1]} : vector<32x16xf32> to vector<32x4xf32>
    %cst_12 = arith.constant dense<0xFF800000> : vector<32xf32>
    %29 = vector.multi_reduction <maximumf>, %28, %cst_12 [1] : vector<32x4xf32> to vector<32xf32>
    %30 = vector.shape_cast %29 : vector<32xf32> to vector<32x1xf32>
    %31 = vector.extract_strided_slice %5 {offsets = [0, 12], sizes = [32, 4], strides = [1, 1]} : vector<32x16xf32> to vector<32x4xf32>
    %cst_13 = arith.constant dense<0xFF800000> : vector<32xf32>
    %32 = vector.multi_reduction <maximumf>, %31, %cst_13 [1] : vector<32x4xf32> to vector<32xf32>
    %33 = vector.shape_cast %32 : vector<32xf32> to vector<32x1xf32>
    %34 = vector.extract_strided_slice %7 {offsets = [0, 0], sizes = [32, 4], strides = [1, 1]} : vector<32x16xf32> to vector<32x4xf32>
    %cst_14 = arith.constant dense<0xFF800000> : vector<32xf32>
    %35 = vector.multi_reduction <maximumf>, %34, %cst_14 [1] : vector<32x4xf32> to vector<32xf32>
    %36 = vector.shape_cast %35 : vector<32xf32> to vector<32x1xf32>
    %37 = vector.extract_strided_slice %7 {offsets = [0, 4], sizes = [32, 4], strides = [1, 1]} : vector<32x16xf32> to vector<32x4xf32>
    %cst_15 = arith.constant dense<0xFF800000> : vector<32xf32>
    %38 = vector.multi_reduction <maximumf>, %37, %cst_15 [1] : vector<32x4xf32> to vector<32xf32>
    %39 = vector.shape_cast %38 : vector<32xf32> to vector<32x1xf32>
    %40 = vector.extract_strided_slice %7 {offsets = [0, 8], sizes = [32, 4], strides = [1, 1]} : vector<32x16xf32> to vector<32x4xf32>
    %cst_16 = arith.constant dense<0xFF800000> : vector<32xf32>
    %41 = vector.multi_reduction <maximumf>, %40, %cst_16 [1] : vector<32x4xf32> to vector<32xf32>
    %42 = vector.shape_cast %41 : vector<32xf32> to vector<32x1xf32>
    %43 = vector.extract_strided_slice %7 {offsets = [0, 12], sizes = [32, 4], strides = [1, 1]} : vector<32x16xf32> to vector<32x4xf32>
    %cst_17 = arith.constant dense<0xFF800000> : vector<32xf32>
    %44 = vector.multi_reduction <maximumf>, %43, %cst_17 [1] : vector<32x4xf32> to vector<32xf32>
    %45 = vector.shape_cast %44 : vector<32xf32> to vector<32x1xf32>
    %46 = vector.extract_strided_slice %9 {offsets = [0, 0], sizes = [32, 4], strides = [1, 1]} : vector<32x16xf32> to vector<32x4xf32>
    %cst_18 = arith.constant dense<0xFF800000> : vector<32xf32>
    %47 = vector.multi_reduction <maximumf>, %46, %cst_18 [1] : vector<32x4xf32> to vector<32xf32>
    %48 = vector.shape_cast %47 : vector<32xf32> to vector<32x1xf32>
    %49 = vector.extract_strided_slice %9 {offsets = [0, 4], sizes = [32, 4], strides = [1, 1]} : vector<32x16xf32> to vector<32x4xf32>
    %cst_19 = arith.constant dense<0xFF800000> : vector<32xf32>
    %50 = vector.multi_reduction <maximumf>, %49, %cst_19 [1] : vector<32x4xf32> to vector<32xf32>
    %51 = vector.shape_cast %50 : vector<32xf32> to vector<32x1xf32>
    %52 = vector.extract_strided_slice %9 {offsets = [0, 8], sizes = [32, 4], strides = [1, 1]} : vector<32x16xf32> to vector<32x4xf32>
    %cst_20 = arith.constant dense<0xFF800000> : vector<32xf32>
    %53 = vector.multi_reduction <maximumf>, %52, %cst_20 [1] : vector<32x4xf32> to vector<32xf32>
    %54 = vector.shape_cast %53 : vector<32xf32> to vector<32x1xf32>
    %55 = vector.extract_strided_slice %9 {offsets = [0, 12], sizes = [32, 4], strides = [1, 1]} : vector<32x16xf32> to vector<32x4xf32>
    %cst_21 = arith.constant dense<0xFF800000> : vector<32xf32>
    %56 = vector.multi_reduction <maximumf>, %55, %cst_21 [1] : vector<32x4xf32> to vector<32xf32>
    %57 = vector.shape_cast %56 : vector<32xf32> to vector<32x1xf32>
    %58 = arith.maximumf %12, %15 : vector<32x1xf32>
    %59 = arith.maximumf %24, %27 : vector<32x1xf32>
    %60 = arith.maximumf %58, %59 : vector<32x1xf32>
    %61 = arith.maximumf %18, %21 : vector<32x1xf32>
    %62 = arith.maximumf %30, %33 : vector<32x1xf32>
    %63 = arith.maximumf %61, %62 : vector<32x1xf32>
    %64 = arith.maximumf %36, %39 : vector<32x1xf32>
    %65 = arith.maximumf %48, %51 : vector<32x1xf32>
    %66 = arith.maximumf %64, %65 : vector<32x1xf32>
    %67 = arith.maximumf %42, %45 : vector<32x1xf32>
    %68 = arith.maximumf %54, %57 : vector<32x1xf32>
    %69 = arith.maximumf %67, %68 : vector<32x1xf32>
    %70 = arith.maximumf %60, %63 : vector<32x1xf32>
    %71 = arith.maximumf %66, %69 : vector<32x1xf32>
    %72 = arith.maximumf %70, %71 : vector<32x1xf32>
    %c0_22 = arith.constant 0 : index
    %c0_23 = arith.constant 0 : index
    %73 = vector.load %arg3[%c0_22, %c0_23] : memref<32x21xf32, #tpu.memory_space<vmem>>, vector<32x21xf32>
    %c0_24 = arith.constant 0 : index
    %c0_25 = arith.constant 0 : index
    %74 = vector.load %arg4[%c0_24, %c0_25] : memref<32x1xf32, #tpu.memory_space<vmem>>, vector<32x1xf32>
    %75 = vector.extract_strided_slice %73 {offsets = [0, 0], sizes = [32, 1], strides = [1, 1]} : vector<32x21xf32> to vector<32x1xf32>
    %76 = arith.mulf %75, %72 : vector<32x1xf32>
    %77 = arith.addf %74, %76 : vector<32x1xf32>
    %78 = vector.extract_strided_slice %73 {offsets = [0, 1], sizes = [32, 1], strides = [1, 1]} : vector<32x21xf32> to vector<32x1xf32>
    %79 = arith.mulf %78, %60 : vector<32x1xf32>
    %80 = arith.addf %77, %79 : vector<32x1xf32>
    %81 = vector.extract_strided_slice %73 {offsets = [0, 2], sizes = [32, 1], strides = [1, 1]} : vector<32x21xf32> to vector<32x1xf32>
    %82 = arith.mulf %81, %63 : vector<32x1xf32>
    %83 = arith.addf %80, %82 : vector<32x1xf32>
    %84 = vector.extract_strided_slice %73 {offsets = [0, 3], sizes = [32, 1], strides = [1, 1]} : vector<32x21xf32> to vector<32x1xf32>
    %85 = arith.mulf %84, %66 : vector<32x1xf32>
    %86 = arith.addf %83, %85 : vector<32x1xf32>
    %87 = vector.extract_strided_slice %73 {offsets = [0, 4], sizes = [32, 1], strides = [1, 1]} : vector<32x21xf32> to vector<32x1xf32>
    %88 = arith.mulf %87, %69 : vector<32x1xf32>
    %89 = arith.addf %86, %88 : vector<32x1xf32>
    %90 = vector.extract_strided_slice %73 {offsets = [0, 5], sizes = [32, 1], strides = [1, 1]} : vector<32x21xf32> to vector<32x1xf32>
    %91 = arith.mulf %90, %12 : vector<32x1xf32>
    %92 = arith.addf %89, %91 : vector<32x1xf32>
    %93 = vector.extract_strided_slice %73 {offsets = [0, 6], sizes = [32, 1], strides = [1, 1]} : vector<32x21xf32> to vector<32x1xf32>
    %94 = arith.mulf %93, %15 : vector<32x1xf32>
    %95 = arith.addf %92, %94 : vector<32x1xf32>
    %96 = vector.extract_strided_slice %73 {offsets = [0, 7], sizes = [32, 1], strides = [1, 1]} : vector<32x21xf32> to vector<32x1xf32>
    %97 = arith.mulf %96, %18 : vector<32x1xf32>
    %98 = arith.addf %95, %97 : vector<32x1xf32>
    %99 = vector.extract_strided_slice %73 {offsets = [0, 8], sizes = [32, 1], strides = [1, 1]} : vector<32x21xf32> to vector<32x1xf32>
    %100 = arith.mulf %99, %21 : vector<32x1xf32>
    %101 = arith.addf %98, %100 : vector<32x1xf32>
    %102 = vector.extract_strided_slice %73 {offsets = [0, 9], sizes = [32, 1], strides = [1, 1]} : vector<32x21xf32> to vector<32x1xf32>
    %103 = arith.mulf %102, %24 : vector<32x1xf32>
    %104 = arith.addf %101, %103 : vector<32x1xf32>
    %105 = vector.extract_strided_slice %73 {offsets = [0, 10], sizes = [32, 1], strides = [1, 1]} : vector<32x21xf32> to vector<32x1xf32>
    %106 = arith.mulf %105, %27 : vector<32x1xf32>
    %107 = arith.addf %104, %106 : vector<32x1xf32>
    %108 = vector.extract_strided_slice %73 {offsets = [0, 11], sizes = [32, 1], strides = [1, 1]} : vector<32x21xf32> to vector<32x1xf32>
    %109 = arith.mulf %108, %30 : vector<32x1xf32>
    %110 = arith.addf %107, %109 : vector<32x1xf32>
    %111 = vector.extract_strided_slice %73 {offsets = [0, 12], sizes = [32, 1], strides = [1, 1]} : vector<32x21xf32> to vector<32x1xf32>
    %112 = arith.mulf %111, %33 : vector<32x1xf32>
    %113 = arith.addf %110, %112 : vector<32x1xf32>
    %114 = vector.extract_strided_slice %73 {offsets = [0, 13], sizes = [32, 1], strides = [1, 1]} : vector<32x21xf32> to vector<32x1xf32>
    %115 = arith.mulf %114, %36 : vector<32x1xf32>
    %116 = arith.addf %113, %115 : vector<32x1xf32>
    %117 = vector.extract_strided_slice %73 {offsets = [0, 14], sizes = [32, 1], strides = [1, 1]} : vector<32x21xf32> to vector<32x1xf32>
    %118 = arith.mulf %117, %39 : vector<32x1xf32>
    %119 = arith.addf %116, %118 : vector<32x1xf32>
    %120 = vector.extract_strided_slice %73 {offsets = [0, 15], sizes = [32, 1], strides = [1, 1]} : vector<32x21xf32> to vector<32x1xf32>
    %121 = arith.mulf %120, %42 : vector<32x1xf32>
    %122 = arith.addf %119, %121 : vector<32x1xf32>
    %123 = vector.extract_strided_slice %73 {offsets = [0, 16], sizes = [32, 1], strides = [1, 1]} : vector<32x21xf32> to vector<32x1xf32>
    %124 = arith.mulf %123, %45 : vector<32x1xf32>
    %125 = arith.addf %122, %124 : vector<32x1xf32>
    %126 = vector.extract_strided_slice %73 {offsets = [0, 17], sizes = [32, 1], strides = [1, 1]} : vector<32x21xf32> to vector<32x1xf32>
    %127 = arith.mulf %126, %48 : vector<32x1xf32>
    %128 = arith.addf %125, %127 : vector<32x1xf32>
    %129 = vector.extract_strided_slice %73 {offsets = [0, 18], sizes = [32, 1], strides = [1, 1]} : vector<32x21xf32> to vector<32x1xf32>
    %130 = arith.mulf %129, %51 : vector<32x1xf32>
    %131 = arith.addf %128, %130 : vector<32x1xf32>
    %132 = vector.extract_strided_slice %73 {offsets = [0, 19], sizes = [32, 1], strides = [1, 1]} : vector<32x21xf32> to vector<32x1xf32>
    %133 = arith.mulf %132, %54 : vector<32x1xf32>
    %134 = arith.addf %131, %133 : vector<32x1xf32>
    %135 = vector.extract_strided_slice %73 {offsets = [0, 20], sizes = [32, 1], strides = [1, 1]} : vector<32x21xf32> to vector<32x1xf32>
    %136 = arith.mulf %135, %57 : vector<32x1xf32>
    %137 = arith.addf %134, %136 : vector<32x1xf32>
    %c0_26 = arith.constant 0 : index
    %c0_27 = arith.constant 0 : index
    %c0_28 = arith.constant 0 : index
    %138 = vector.load %arg5[%c0_26, %c0_27, %c0_28] : memref<1x32x1xf32, #tpu.memory_space<vmem>>, vector<1x32x1xf32>
    %139 = vector.shape_cast %138 : vector<1x32x1xf32> to vector<32x1xf32>
    %140 = vector.shape_cast %137 : vector<32x1xf32> to vector<1x32x1xf32>
    tpu.vector_store %arg5[%c0_26, %c0_27, %c0_28], %140 {strides = array<i32>} : memref<1x32x1xf32, #tpu.memory_space<vmem>>, vector<1x32x1xf32>,
    return
  }
  func.func @transform_0(%arg0: i32, %arg1: i32) -> (i32, i32, i32, i32) {
    %c0_i32 = arith.constant 0 : i32
    %c0_i32_0 = arith.constant 0 : i32
    %c0_i32_1 = arith.constant 0 : i32
    return %arg0, %arg1, %c0_i32, %c0_i32_0 : i32, i32, i32, i32
  }
  func.func @transform_1(%arg0: i32, %arg1: i32) -> (i32, i32) {
    %c0_i32 = arith.constant 0 : i32
    %c0_i32_0 = arith.constant 0 : i32
    return %arg1, %c0_i32 : i32, i32
  }
  func.func @transform_2(%arg0: i32, %arg1: i32) -> (i32, i32) {
    %c0_i32 = arith.constant 0 : i32
    %c0_i32_0 = arith.constant 0 : i32
    return %arg1, %c0_i32 : i32, i32
  }
  func.func @transform_3(%arg0: i32, %arg1: i32) -> (i32, i32, i32) {
    %c0_i32 = arith.constant 0 : i32
    %c0_i32_0 = arith.constant 0 : i32
    return %arg0, %arg1, %c0_i32 : i32, i32, i32
  }
}

</mosaic_0001>

<bundles_post_ra>
// kernel: tpu_custom_call.1
= control target key start
LH: loop header
LB: loop body
LE: loop exit
PB: predicated region body
PF: predicated region fallthrough
CT: control target
= control target key end

     0   :  { %s2488_s12 = smov 0   ;;  %s2490_s13 = smov 0   ;;  %s3713_s0 = inlined_call_operand.vmem [shape: f32[2,32,16,16], index: 0, kind: input, shape index: {}]   ;;  %s3714_s1 = inlined_call_operand.vmem [shape: f32[32,21], index: 1, kind: input, shape index: {}]   ;;  %s3715_s2 = inlined_call_operand.vmem [shape: f32[32,1], index: 2, kind: input, shape index: {}]   ;;  %s3716_s3 = inlined_call_operand.vmem [shape: f32[2,32,1], index: 3, kind: output, shape index: {}]  }
   0x1   :  { %s2492_s14 = smov 0  }
   0x2 LB: > { %s25_s15 = sadd.s32 1, %s2442_s13  ;;  %p2365_p0 = scmp.ge.s32.totalorder %s2446_s14, 1  ;;  %s2446_s14 = sphi %s2492_s14, %s13_s14   ;;  %s2442_s13 = sphi %s2490_s13, %s3797_s13   ;;  %s2438_s12 = sphi %s2488_s12, %s3796_s12  }
   0x3   : > { %p27_p1 = scmp.ge.s32.totalorder %s25_s15, 2  ;;  %p181_p2 = scmp.lt.s32.totalorder %s2446_s14, 3 }
   0x5   : > { %s3799_s15 = smov (%p27_p1, %s25_s15), 0  ;;  %p182_p3 = pnand %p2365_p0, %p181_p2 }
   0x7   : > { %185 = sbr.rel (%p182_p3) target bundleno = 707 (0x2c3), region = 32 }
   0xe   : > { %p225_p4 = scmp.lt.s32.totalorder %s2438_s12, 1  ;;  %vm321_vm0 = vcmask 125952   ;;  %vm1251_vm1 = vcmask 1041409   ;;  %vm1253_vm2 = vcmask 1042434   ;;  %vm1255_vm3 = vcmask 1043459   ;;  %s2448_s24 = smov 127  }
   0xf   : > { %vm1257_vm4 = vcmask 1044484   ;;  %vm1259_vm5 = vcmask 1045509   ;;  %vm1261_vm6 = vcmask 1046534   ;;  %vm1263_vm7 = vcmask 1047559   ;;  %s2449_s27 = smov 126   ;;  %s2450_s30 = smov 123  }
  0x10   : > { %s3801_s12 = smov (!%p225_p4, %s2438_s12), 1  ;;  %vm1290_vm8 = vcmask 31744   ;;  %vm1303_vm9 = vcmask 64544   ;;  %vm1316_vm10 = vcmask 97344   ;;  %vm1329_vm11 = vcmask 130144   ;;  %s2451_s4 = smov 125  }
  0x11   : > { %s2372_s16 = sshll.u32 %s3801_s12, 9  ;;  %vm546_vm12 = vcmask 130052   ;;  %s2452_s5 = smov 124   ;;  %vm2234_vm13 = vcmask 7168  }
  0x12   : > { %s2512_s19 = scalar_lea.vmem %s3713_s0, %s2372_s16  ;;  %s2453_s10 = smov 122  }
  0x13   : > { %v2515_v0 = vld [vmem:[%s2512_s19 + $0x100] sm:$0xff]  ;;  %v2518_v1 = vld [vmem:[%s2512_s19 + $0x110] sm:$0xff]  ;;  %s2455_s20 = smov 120   ;;  %s2456_s21 = smov 119  }
  0x14   : > { %v293_v2 = vld [vmem:[%s2512_s19 + $0x120] sm:$0xff]  ;;  %v295_v3 = vld [vmem:[%s2512_s19 + $0x130] sm:$0xff]  ;;  %v434_v6 = vsel %vm321_vm0, %v2515_v0, -inf  ;;  %v441_v7 = vsel %vm321_vm0, %v2518_v1, -inf  ;;  %s2457_s22 = smov 118   ;;  %s2458_s23 = smov 117  }
  0x15   : > { %v297_v4 = vld [vmem:[%s2512_s19 + $0x140] sm:$0xff]  ;;  %v299_v5 = vld [vmem:[%s2512_s19 + $0x150] sm:$0xff]  ;;  %v448_v8 = vsel %vm321_vm0, %v293_v2, -inf  ;;  %v435_v11 = vrot.slane %v434_v6, 4  ;;  %v442_v12 = vrot.slane %v441_v7, 4  ;;  %v455_v14 = vsel %vm321_vm0, %v295_v3, -inf }
  0x16   : > { %v301_v9 = vld [vmem:[%s2512_s19 + $0x160] sm:$0xff]  ;;  %v303_v10 = vld [vmem:[%s2512_s19 + $0x170] sm:$0xff]  ;;  %v449_v13 = vrot.slane %v448_v8, 4  ;;  %v456_v15 = vrot.slane %v455_v14, 4  ;;  %v462_v16 = vsel %vm321_vm0, %v297_v4, -inf  ;;  %v469_v17 = vsel %vm321_vm0, %v299_v5, -inf }
  0x17   : > { %v476_v18 = vsel %vm321_vm0, %v301_v9, -inf  ;;  %v436_v19 = vmax.f32 %v434_v6, %v435_v11  ;;  %v443_v20 = vmax.f32 %v441_v7, %v442_v12  ;;  %v463_v22 = vrot.slane %v462_v16, 4  ;;  %v2537_v51 = vld [vmem:[%s2512_s19] sm:$0xff]  ;;  %v2540_v52 = vld [vmem:[%s2512_s19 + $0x10] sm:$0xff]  ;;  %s2460_s25 = smov 115   ;;  %s2461_s26 = smov 114  }
  0x18   : > { %v450_v21 = vmax.f32 %v448_v8, %v449_v13  ;;  %v457_v23 = vmax.f32 %v455_v14, %v456_v15  ;;  %v470_v24 = vrot.slane %v469_v17, 4  ;;  %v477_v25 = vrot.slane %v476_v18, 4  ;;  %v2543_v61 = vld [vmem:[%s2512_s19 + $0x20] sm:$0xff]  ;;  %v2547_v2 = vld [vmem:[%s2512_s19 + $0x30] sm:$0xff]  ;;  %s2463_s28 = smov 112   ;;  %s2464_s29 = smov 111  }
  0x19   : > { %v483_v26 = vsel %vm321_vm0, %v303_v10, -inf  ;;  %v437_v27 = vrot.slane %v436_v19, 2  ;;  %v444_v28 = vrot.slane %v443_v20, 2  ;;  %v464_v30 = vmax.f32 %v462_v16, %v463_v22  ;;  %v2556_v10 = vld [vmem:[%s2512_s19 + $0x40] sm:$0xff]  ;;  %v2559_v11 = vld [vmem:[%s2512_s19 + $0x50] sm:$0xff]  ;;  %s2373_s6 = sshll.u32 %s3801_s12, 5 }
  0x1a   : > { %v451_v29 = vrot.slane %v450_v21, 2  ;;  %v458_v31 = vrot.slane %v457_v23, 2  ;;  %v471_v32 = vmax.f32 %v469_v17, %v470_v24  ;;  %v478_v33 = vmax.f32 %v476_v18, %v477_v25  ;;  %v2569_v24 = vld [vmem:[%s2512_s19 + $0x60] sm:$0xff]  ;;  %s255_s9 = scalar_lea.vmem %s3716_s3, %s2373_s6 }
  0x1b   : > { %v484_v34 = vrot.slane %v483_v26, 4  ;;  %v438_v35 = vmax.f32 %v436_v19, %v437_v27  ;;  %v445_v36 = vmax.f32 %v443_v20, %v444_v28  ;;  %v465_v38 = vrot.slane %v464_v30, 2 }
  0x1c   : > { %v452_v37 = vmax.f32 %v450_v21, %v451_v29  ;;  %v459_v39 = vmax.f32 %v457_v23, %v458_v31  ;;  %v472_v40 = vrot.slane %v471_v32, 2  ;;  %v479_v41 = vrot.slane %v478_v33, 2 }
  0x1d   : > { %v485_v42 = vmax.f32 %v483_v26, %v484_v34  ;;  %v439_v43 = vrot.slane %v438_v35, 1  ;;  %v446_v44 = vrot.slane %v445_v36, 1  ;;  %v466_v46 = vmax.f32 %v464_v30, %v465_v38 }
  0x1e   : > { %v453_v45 = vrot.slane %v452_v37, 1  ;;  %v460_v47 = vrot.slane %v459_v39, 1  ;;  %v473_v48 = vmax.f32 %v471_v32, %v472_v40  ;;  %v480_v49 = vmax.f32 %v478_v33, %v479_v41  ;;  %v2581_v33 = vld [vmem:[%s2512_s19 + $0x70] sm:$0xff] }
  0x1f   : > { %v486_v50 = vrot.slane %v485_v42, 2  ;;  %v440_v53 = vmax.f32 %v438_v35, %v439_v43  ;;  %v447_v54 = vmax.f32 %v445_v36, %v446_v44  ;;  %v467_v56 = vrot.slane %v466_v46, 1 }
  0x20   : > { %v454_v55 = vmax.f32 %v452_v37, %v453_v45  ;;  %v461_v57 = vmax.f32 %v459_v39, %v460_v47  ;;  %v474_v58 = vrot.slane %v473_v48, 1  ;;  %v481_v59 = vrot.slane %v480_v49, 1 }
  0x21   : > { %v487_v60 = vmax.f32 %v485_v42, %v486_v50  ;;  %v468_v62 = vmax.f32 %v466_v46, %v467_v56  ;;  %v1272_v63 = vsel %vm1251_vm1, %v447_v54, %v440_v53  ;;  %v322_v3 = vsel %vm321_vm0, %v2537_v51, -inf }
  0x22   : > { %v329_v4 = vsel %vm321_vm0, %v2540_v52, -inf  ;;  %v475_v5 = vmax.f32 %v473_v48, %v474_v58  ;;  %v482_v6 = vmax.f32 %v480_v49, %v481_v59  ;;  %v1273_v8 = vsel %vm1253_vm2, %v454_v55, %v1272_v63  ;;  %v2588_v55 = vld [vmem:[%s2512_s19 + $0x180] sm:$0xff] }
  0x23   : > { %v488_v7 = vrot.slane %v487_v60, 1  ;;  %v1274_v9 = vsel %vm1255_vm3, %v461_v57, %v1273_v8  ;;  %v323_v12 = vrot.slane %v322_v3, 4  ;;  %v330_v13 = vrot.slane %v329_v4, 4 }
  0x24   : > { %v336_v14 = vsel %vm321_vm0, %v2543_v61, -inf  ;;  %v1275_v16 = vsel %vm1257_vm4, %v468_v62, %v1274_v9  ;;  %v343_v18 = vsel %vm321_vm0, %v2547_v2, -inf  ;;  %v350_v26 = vsel %vm321_vm0, %v2556_v10, -inf }
  0x25   : > { %v489_v15 = vmax.f32 %v487_v60, %v488_v7  ;;  %v337_v17 = vrot.slane %v336_v14, 4  ;;  %v1276_v19 = vsel %vm1259_vm5, %v475_v5, %v1275_v16  ;;  %v324_v20 = vmax.f32 %v322_v3, %v323_v12  ;;  %v2601_v16 = vld [vmem:[%s2512_s19 + $0x1b0] sm:$0xff] }
  0x26   : > { %v331_v21 = vmax.f32 %v329_v4, %v330_v13  ;;  %v344_v22 = vrot.slane %v343_v18, 4  ;;  %v1277_v23 = vsel %vm1261_vm6, %v482_v6, %v1276_v19  ;;  %v357_v27 = vsel %vm321_vm0, %v2559_v11, -inf  ;;  %v2591_v4 = vld [vmem:[%s2512_s19 + $0x190] sm:$0xff] }
  0x27   : > { %v338_v25 = vmax.f32 %v336_v14, %v337_v17  ;;  %v2576_v28 = vsel %vm1263_vm7, %v489_v15, %v1277_v23  ;;  %v325_v29 = vrot.slane %v324_v20, 2  ;;  %v351_v35 = vrot.slane %v350_v26, 4  ;;  %v2598_v15 = vld [vmem:[%s2512_s19 + $0x1a0] sm:$0xff] }
  0x28   : > { %v332_v30 = vrot.slane %v331_v21, 2  ;;  %v345_v31 = vmax.f32 %v343_v18, %v344_v22  ;;  %v1297_v32 = vsel %vm1290_vm8, %v2576_v28, -inf  ;;  %v358_v36 = vrot.slane %v357_v27, 4 }
  0x29   : > { %v339_v34 = vrot.slane %v338_v25, 2  ;;  %1298 = vmax.xlane.f32.xlu1 %v1297_v32  ;;  %v326_v37 = vmax.f32 %v324_v20, %v325_v29  ;;  %v364_v40 = vsel %vm321_vm0, %v2569_v24, -inf  ;;  %v352_v42 = vmax.f32 %v350_v26, %v351_v35 }
  0x2a   : > { %v333_v38 = vmax.f32 %v331_v21, %v332_v30  ;;  %v346_v39 = vrot.slane %v345_v31, 2  ;;  %v359_v43 = vmax.f32 %v357_v27, %v358_v36  ;;  %v365_v44 = vrot.slane %v364_v40, 4  ;;  %v2607_v27 = vld [vmem:[%s2512_s19 + $0x1c0] sm:$0xff] }
  0x2b   : > { %v340_v41 = vmax.f32 %v338_v25, %v339_v34  ;;  %v327_v45 = vrot.slane %v326_v37, 1  ;;  %v371_v48 = vsel %vm321_vm0, %v2581_v33, -inf  ;;  %v353_v50 = vrot.slane %v352_v42, 2 }
  0x2c   : > { %v334_v46 = vrot.slane %v333_v38, 1  ;;  %v347_v47 = vmax.f32 %v345_v31, %v346_v39  ;;  %v360_v53 = vrot.slane %v359_v43, 2  ;;  %v366_v54 = vmax.f32 %v364_v40, %v365_v44  ;;  %v2616_v39 = vld [vmem:[%s2512_s19 + $0x1d0] sm:$0xff]  ;;  %v2619_v40 = vld [vmem:[%s2512_s19 + $0x1e0] sm:$0xff] }
  0x2d   : > { %v341_v49 = vrot.slane %v340_v41, 1  ;;  %v328_v56 = vmax.f32 %v326_v37, %v327_v45  ;;  %v372_v59 = vrot.slane %v371_v48, 4  ;;  %v354_v62 = vmax.f32 %v352_v42, %v353_v50 }
  0x2e   : > { %v335_v57 = vmax.f32 %v333_v38, %v334_v46  ;;  %v348_v58 = vrot.slane %v347_v47, 1  ;;  %v361_v63 = vmax.f32 %v359_v43, %v360_v53  ;;  %v367_v3 = vrot.slane %v366_v54, 2 }
  0x2f   : > { %v342_v60 = vmax.f32 %v340_v41, %v341_v49  ;;  %v373_v6 = vmax.f32 %v371_v48, %v372_v59  ;;  %v490_v8 = vsel %vm321_vm0, %v2588_v55, -inf  ;;  %v355_v9 = vrot.slane %v354_v62, 1  ;;  %v2632_v59 = vld [vmem:[%s2512_s19 + $0x1f0] sm:$0xff] }
  0x30   : > { %v349_v5 = vmax.f32 %v347_v47, %v348_v58  ;;  %v1252_v7 = vsel %vm1251_vm1, %v335_v57, %v328_v56  ;;  %v362_v12 = vrot.slane %v361_v63, 1  ;;  %v368_v13 = vmax.f32 %v366_v54, %v367_v3 }
  0x31   : > { %v1254_v14 = vsel %vm1253_vm2, %v342_v60, %v1252_v7  ;;  %v374_v17 = vrot.slane %v373_v6, 2  ;;  %v491_v19 = vrot.slane %v490_v8, 4  ;;  %v497_v20 = vsel %vm321_vm0, %v2591_v4, -inf }
  0x32   : > { %v1256_v18 = vsel %vm1255_vm3, %v349_v5, %v1254_v14  ;;  %v356_v21 = vmax.f32 %v354_v62, %v355_v9  ;;  %v363_v22 = vmax.f32 %v361_v63, %v362_v12  ;;  %v369_v23 = vrot.slane %v368_v13, 1  ;;  %v2637_v14 = vld [vmem:[%s2512_s19 + $0x80] sm:$0xff] }
  0x33   : > { %v498_v25 = vrot.slane %v497_v20, 4  ;;  %v375_v26 = vmax.f32 %v373_v6, %v374_v17  ;;  %v492_v29 = vmax.f32 %v490_v8, %v491_v19  ;;  %v504_v30 = vsel %vm321_vm0, %v2598_v15, -inf }
  0x34   : > { %v511_v31 = vsel %vm321_vm0, %v2601_v16, -inf  ;;  %v370_v32 = vmax.f32 %v368_v13, %v369_v23  ;;  %v1258_v34 = vsel %vm1257_vm4, %v356_v21, %v1256_v18  ;;  %v505_v36 = vrot.slane %v504_v30, 4 }
  0x35   : > { %v499_v35 = vmax.f32 %v497_v20, %v498_v25  ;;  %v376_v37 = vrot.slane %v375_v26, 1  ;;  %v1260_v38 = vsel %vm1259_vm5, %v363_v22, %v1258_v34  ;;  %v493_v41 = vrot.slane %v492_v29, 2 }
  0x36   : > { %v512_v42 = vrot.slane %v511_v31, 4  ;;  %v1262_v43 = vsel %vm1261_vm6, %v370_v32, %v1260_v38  ;;  %v506_v45 = vmax.f32 %v504_v30, %v505_v36  ;;  %v518_v46 = vsel %vm321_vm0, %v2607_v27, -inf  ;;  %v2648_v38 = vld [vmem:[%s2512_s19 + $0xa0] sm:$0xff] }
  0x37   : > { %v500_v44 = vrot.slane %v499_v35, 2  ;;  %v377_v47 = vmax.f32 %v375_v26, %v376_v37  ;;  %v494_v48 = vmax.f32 %v492_v29, %v493_v41  ;;  %v519_v50 = vrot.slane %v518_v46, 4  ;;  %v2642_v26 = vld [vmem:[%s2512_s19 + $0x90] sm:$0xff] }
  0x38   : > { %v513_v49 = vmax.f32 %v511_v31, %v512_v42  ;;  %v507_v54 = vrot.slane %v506_v45, 2  ;;  %v525_v56 = vsel %vm321_vm0, %v2616_v39, -inf  ;;  %v532_v57 = vsel %vm321_vm0, %v2619_v40, -inf }
  0x39   : > { %v501_v53 = vmax.f32 %v499_v35, %v500_v44  ;;  %v2629_v58 = vsel %vm1263_vm7, %v377_v47, %v1262_v43  ;;  %v495_v60 = vrot.slane %v494_v48, 1  ;;  %v520_v63 = vmax.f32 %v518_v46, %v519_v50 }
  0x3a   : > { %v514_v62 = vrot.slane %v513_v49, 2  ;;  %v1291_v3 = vsel %vm1290_vm8, %v2629_v58, -inf  ;;  %v508_v6 = vmax.f32 %v506_v45, %v507_v54  ;;  %v526_v7 = vrot.slane %v525_v56, 4 }
  0x3b   : > { %v502_v5 = vrot.slane %v501_v53, 1  ;;  %1292 = vmax.xlane.f32.xlu0 %v1291_v3  ;;  %v496_v8 = vmax.f32 %v494_v48, %v495_v60  ;;  %v521_v12 = vrot.slane %v520_v63, 2  ;;  %v533_v13 = vrot.slane %v532_v57, 4 }
  0x3c   : > { %v515_v9 = vmax.f32 %v513_v49, %v514_v62  ;;  %v509_v18 = vrot.slane %v508_v6, 1  ;;  %v527_v19 = vmax.f32 %v525_v56, %v526_v7  ;;  %v539_v20 = vsel %vm321_vm0, %v2632_v59, -inf  ;;  %v2655_v49 = vld [vmem:[%s2512_s19 + $0xb0] sm:$0xff] }
  0x3d   : > { %v503_v17 = vmax.f32 %v501_v53, %v502_v5  ;;  %v522_v22 = vmax.f32 %v520_v63, %v521_v12  ;;  %v534_v23 = vmax.f32 %v532_v57, %v533_v13  ;;  %v540_v25 = vrot.slane %v539_v20, 4  ;;  %v2661_v63 = vld [vmem:[%s2512_s19 + $0xc0] sm:$0xff]  ;;  %v2666_v13 = vld [vmem:[%s2512_s19 + $0xd0] sm:$0xff] }
  0x3e   : > { %v516_v21 = vrot.slane %v515_v9, 1  ;;  %v510_v29 = vmax.f32 %v508_v6, %v509_v18  ;;  %v528_v30 = vrot.slane %v527_v19, 2  ;;  %v378_v32 = vsel %vm321_vm0, %v2637_v14, -inf }
  0x3f   : > { %v1279_v31 = vsel %vm1251_vm1, %v503_v17, %v496_v8  ;;  %v523_v35 = vrot.slane %v522_v22, 1  ;;  %v535_v36 = vrot.slane %v534_v23, 2  ;;  %v541_v37 = vmax.f32 %v539_v20, %v540_v25 }
  0x40   : > { %v517_v34 = vmax.f32 %v515_v9, %v516_v21  ;;  %v529_v41 = vmax.f32 %v527_v19, %v528_v30  ;;  %v1280_v42 = vsel %vm1253_vm2, %v510_v29, %v1279_v31  ;;  %v379_v43 = vrot.slane %v378_v32, 4  ;;  %v2673_v31 = vld [vmem:[%s2512_s19 + $0xe0] sm:$0xff] }
  0x41   : > { %v385_v44 = vsel %vm321_vm0, %v2642_v26, -inf  ;;  %v524_v45 = vmax.f32 %v522_v22, %v523_v35  ;;  %v536_v46 = vmax.f32 %v534_v23, %v535_v36  ;;  %v542_v47 = vrot.slane %v541_v37, 2 }
  0x42   : > { %v1281_v48 = vsel %vm1255_vm3, %v517_v34, %v1280_v42  ;;  %v530_v50 = vrot.slane %v529_v41, 1  ;;  %v380_v53 = vmax.f32 %v378_v32, %v379_v43  ;;  %v386_v54 = vrot.slane %v385_v44, 4 }
  0x43   : > { %v392_v56 = vsel %vm321_vm0, %v2648_v38, -inf  ;;  %v537_v57 = vrot.slane %v536_v46, 1  ;;  %v543_v60 = vmax.f32 %v541_v37, %v542_v47  ;;  %v1282_v62 = vsel %vm1257_vm4, %v524_v45, %v1281_v48 }
  0x44   : > { %v393_v3 = vrot.slane %v392_v56, 4  ;;  %v531_v5 = vmax.f32 %v529_v41, %v530_v50  ;;  %v381_v6 = vrot.slane %v380_v53, 2  ;;  %v387_v7 = vmax.f32 %v385_v44, %v386_v54  ;;  %v2679_v41 = vld [vmem:[%s2512_s19 + $0xf0] sm:$0xff] }
  0x45   : > { %v399_v8 = vsel %vm321_vm0, %v2655_v49, -inf  ;;  %v538_v9 = vmax.f32 %v536_v46, %v537_v57  ;;  %v544_v12 = vrot.slane %v543_v60, 1  ;;  %v406_v22 = vsel %vm321_vm0, %v2661_v63, -inf }
  0x46   : > { %v394_v17 = vmax.f32 %v392_v56, %v393_v3  ;;  %v400_v18 = vrot.slane %v399_v8, 4  ;;  %v1283_v19 = vsel %vm1259_vm5, %v531_v5, %v1282_v62  ;;  %v382_v20 = vmax.f32 %v380_v53, %v381_v6 }
  0x47   : > { %v388_v21 = vrot.slane %v387_v7, 2  ;;  %v545_v23 = vmax.f32 %v543_v60, %v544_v12  ;;  %v1284_v25 = vsel %vm1261_vm6, %v538_v9, %v1283_v19  ;;  %v407_v35 = vrot.slane %v406_v22, 4 }
  0x48   : > { %v395_v29 = vrot.slane %v394_v17, 2  ;;  %v401_v30 = vmax.f32 %v399_v8, %v400_v18  ;;  %v383_v32 = vrot.slane %v382_v20, 1  ;;  %v413_v36 = vsel %vm321_vm0, %v2666_v13, -inf }
  0x49   : > { %v389_v34 = vmax.f32 %v387_v7, %v388_v21  ;;  %v1285_v37 = vsel %vm1263_vm7, %v545_v23, %v1284_v25  ;;  %v414_v44 = vrot.slane %v413_v36, 4  ;;  %v408_v48 = vmax.f32 %v406_v22, %v407_v35 }
  0x4a   : > { %v396_v42 = vmax.f32 %v394_v17, %v395_v29  ;;  %v402_v43 = vrot.slane %v401_v30, 2  ;;  %v1300_v45 = vsel %vm1290_vm8, %v1285_v37, -inf  ;;  %v384_v46 = vmax.f32 %v382_v20, %v383_v32 }
  0x4b   : > { %v390_v47 = vrot.slane %v389_v34, 1  ;;  %1301 = vmax.xlane.f32.xlu1 %v1300_v45  ;;  %v415_v54 = vmax.f32 %v413_v36, %v414_v44  ;;  %v420_v56 = vsel %vm321_vm0, %v2673_v31, -inf  ;;  %v409_v60 = vrot.slane %v408_v48, 2 }
  0x4c   : > { %v397_v50 = vrot.slane %v396_v42, 1  ;;  %v403_v53 = vmax.f32 %v401_v30, %v402_v43  ;;  %v421_v62 = vrot.slane %v420_v56, 4  ;;  %v427_v3 = vsel %vm321_vm0, %v2679_v41, -inf }
  0x4d   : > { %v391_v57 = vmax.f32 %v389_v34, %v390_v47  ;;  %v416_v7 = vrot.slane %v415_v54, 2  ;;  %v428_v8 = vrot.slane %v427_v3, 4  ;;  %v410_v9 = vmax.f32 %v408_v48, %v409_v60 }
  0x4e   : > { %v398_v5 = vmax.f32 %v396_v42, %v397_v50  ;;  %v404_v6 = vrot.slane %v403_v53, 1  ;;  %v422_v12 = vmax.f32 %v420_v56, %v421_v62  ;;  %v2689_v18 = vsel %vm1303_vm9, %v2629_v58, -inf }
  0x4f   : > { %v1265_v17 = vsel %vm1251_vm1, %v391_v57, %v384_v46  ;;  %v417_v20 = vmax.f32 %v415_v54, %v416_v7  ;;  %v429_v21 = vmax.f32 %v427_v3, %v428_v8  ;;  %v411_v23 = vrot.slane %v410_v9, 1 }
  0x50   : > { %v405_v19 = vmax.f32 %v403_v53, %v404_v6  ;;  %v1266_v22 = vsel %vm1253_vm2, %v398_v5, %v1265_v17  ;;  %v423_v25 = vrot.slane %v422_v12, 2  ;;  %v1313_v29 = vsel %vm1303_vm9, %v1285_v37, -inf }
  0x51   : > { %v2695_v30 = vsel %vm1303_vm9, %v2576_v28, -inf  ;;  %v418_v32 = vrot.slane %v417_v20, 1  ;;  %v430_v34 = vrot.slane %v429_v21, 2  ;;  %v2700_v36 = vsel %vm1316_vm10, %v2629_v58, -inf }
  0x52   : > { %v1267_v35 = vsel %vm1255_vm3, %v405_v19, %v1266_v22  ;;  %v412_v42 = vmax.f32 %v410_v9, %v411_v23  ;;  %v424_v43 = vmax.f32 %v422_v12, %v423_v25  ;;  %v2703_v44 = vsel %vm1316_vm10, %v1285_v37, -inf }
  0x53   : > { %v2707_v45 = vsel %vm1316_vm10, %v2576_v28, -inf  ;;  %v419_v46 = vmax.f32 %v417_v20, %v418_v32  ;;  %v431_v47 = vmax.f32 %v429_v21, %v430_v34  ;;  %v2711_v48 = vsel %vm1329_vm11, %v2629_v58, -inf }
  0x54   : > { %v2714_v50 = vsel %vm1329_vm11, %v1285_v37, -inf  ;;  %v425_v53 = vrot.slane %v424_v43, 1  ;;  %v1268_v54 = vsel %vm1257_vm4, %v412_v42, %v1267_v35  ;;  %v2719_v56 = vsel %vm1329_vm11, %v2576_v28, -inf }
  0x55   : > { %v603_v57 = vsel %vm546_vm12, %v2637_v14, -inf  ;;  %v432_v60 = vrot.slane %v431_v47, 1  ;;  %v1269_v62 = vsel %vm1259_vm5, %v419_v46, %v1268_v54  ;;  %v610_v58 = vsel %vm546_vm12, %v2642_v26, -inf }
  0x56   : > { %v604_v3 = vrot.slane %v603_v57, 4  ;;  %v426_v5 = vmax.f32 %v424_v43, %v425_v53  ;;  %v611_v37 = vrot.slane %v610_v58, 4  ;;  %v617_v6 = vsel %vm546_vm12, %v2648_v38, -inf }
  0x57   : > { %v624_v7 = vsel %vm546_vm12, %v2655_v49, -inf  ;;  %v433_v28 = vmax.f32 %v431_v47, %v432_v60  ;;  %v618_v9 = vrot.slane %v617_v6, 4  ;;  %v631_v19 = vsel %vm546_vm12, %v2661_v63, -inf }
  0x58   : > { %v605_v8 = vmax.f32 %v603_v57, %v604_v3  ;;  %v625_v12 = vrot.slane %v624_v7, 4  ;;  %v1270_v14 = vsel %vm1261_vm6, %v426_v5, %v1269_v62  ;;  %v612_v17 = vmax.f32 %v610_v58, %v611_v37 }
  0x59   : > { %v638_v26 = vsel %vm546_vm12, %v2666_v13, -inf  ;;  %v1271_v20 = vsel %vm1263_vm7, %v433_v28, %v1270_v14  ;;  %v619_v38 = vmax.f32 %v617_v6, %v618_v9  ;;  %v632_v42 = vrot.slane %v631_v19, 4 }
  0x5a   : > { %v606_v21 = vrot.slane %v605_v8, 2  ;;  %v626_v22 = vmax.f32 %v624_v7, %v625_v12  ;;  %v1294_v49 = vsel %vm1290_vm8, %v1271_v20, -inf  ;;  %v1307_v23 = vsel %vm1303_vm9, %v1271_v20, -inf }
  0x5b   : > { %v1320_v25 = vsel %vm1316_vm10, %v1271_v20, -inf  ;;  %v2740_v32 = vsel %vm1329_vm11, %v1271_v20, -inf  ;;  %1295 = vmax.xlane.f32.xlu0 %v1294_v49  ;;  %1308 = vmax.xlane.f32.xlu1 %v1307_v23  ;;  %v613_v34 = vrot.slane %v612_v17, 2  ;;  %v620_v35 = vrot.slane %v619_v38, 2 }
  0x5c   : > { %v607_v63 = vmax.f32 %v605_v8, %v606_v21  ;;  %v627_v13 = vrot.slane %v626_v22, 2  ;;  %v639_v43 = vrot.slane %v638_v26, 4  ;;  %v645_v46 = vsel %vm546_vm12, %v2673_v31, -inf }
  0x5d   : > { %v652_v47 = vsel %vm546_vm12, %v2679_v41, -inf  ;;  %v614_v54 = vmax.f32 %v612_v17, %v613_v34  ;;  %v621_v57 = vmax.f32 %v619_v38, %v620_v35  ;;  %v633_v62 = vmax.f32 %v631_v19, %v632_v42 }
  0x5e   : > { %v608_v53 = vrot.slane %v607_v63, 1  ;;  %v628_v60 = vmax.f32 %v626_v22, %v627_v13  ;;  %v640_v3 = vmax.f32 %v638_v26, %v639_v43  ;;  %v646_v58 = vrot.slane %v645_v46, 4 }
  0x5f   : > { %v653_v5 = vrot.slane %v652_v47, 4  ;;  %1305 = vmax.xlane.f32.xlu0 %v2689_v18  ;;  %1314 = vmax.xlane.f32.xlu1 %v1313_v29  ;;  %v615_v6 = vrot.slane %v614_v54, 1  ;;  %v622_v7 = vrot.slane %v621_v57, 1  ;;  %v634_v8 = vrot.slane %v633_v62, 2 }
  0x60   : > { %v609_v37 = vmax.f32 %v607_v63, %v608_v53  ;;  %v629_v28 = vrot.slane %v628_v60, 1  ;;  %v641_v31 = vrot.slane %v640_v3, 2  ;;  %v647_v9 = vmax.f32 %v645_v46, %v646_v58 }
  0x61   : > { %v654_v12 = vmax.f32 %v652_v47, %v653_v5  ;;  %v616_v41 = vmax.f32 %v614_v54, %v615_v6  ;;  %v623_v14 = vmax.f32 %v621_v57, %v622_v7  ;;  %v547_v19 = vsel %vm546_vm12, %v2537_v51, -inf }
  0x62   : > { %v630_v17 = vmax.f32 %v628_v60, %v629_v28  ;;  %v635_v26 = vmax.f32 %v633_v62, %v634_v8  ;;  %v642_v20 = vmax.f32 %v640_v3, %v641_v31  ;;  %v648_v21 = vrot.slane %v647_v9, 2 }
  0x63   : > { %v655_v38 = vrot.slane %v654_v12, 2  ;;  %1311 = vmax.xlane.f32.xlu0 %v2695_v30  ;;  %1321 = vmax.xlane.f32.xlu1 %v1320_v25  ;;  %v1381_v18 = vsel %vm1251_vm1, %v616_v41, %v609_v37  ;;  %v548_v29 = vrot.slane %v547_v19, 4  ;;  %v554_v22 = vsel %vm546_vm12, %v2540_v52, -inf }
  0x64   : > { %v561_v49 = vsel %vm546_vm12, %v2543_v61, -inf  ;;  %v636_v23 = vrot.slane %v635_v26, 1  ;;  %v643_v63 = vrot.slane %v642_v20, 1  ;;  %v649_v34 = vmax.f32 %v647_v9, %v648_v21 }
  0x65   : > { %v656_v51 = vmax.f32 %v654_v12, %v655_v38  ;;  %v1382_v35 = vsel %vm1253_vm2, %v623_v14, %v1381_v18  ;;  %v549_v13 = vmax.f32 %v547_v19, %v548_v29  ;;  %v555_v42 = vrot.slane %v554_v22, 4 }
  0x66   : > { %v562_v43 = vrot.slane %v561_v49, 4  ;;  %v637_v30 = vmax.f32 %v635_v26, %v636_v23  ;;  %v644_v25 = vmax.f32 %v642_v20, %v643_v63  ;;  %v650_v46 = vrot.slane %v649_v34, 1 }
  0x67   : > { %v657_v47 = vrot.slane %v656_v51, 1  ;;  %1318 = vmax.xlane.f32.xlu0 %v2700_v36  ;;  %1327 = vmax.xlane.f32.xlu1 %v2703_v44  ;;  %v1383_v52 = vsel %vm1255_vm3, %v630_v17, %v1382_v35  ;;  %v550_v61 = vrot.slane %v549_v13, 2  ;;  %v556_v53 = vmax.f32 %v554_v22, %v555_v42 }
  0x68   : > { %v563_v54 = vmax.f32 %v561_v49, %v562_v43  ;;  %v651_v57 = vmax.f32 %v649_v34, %v650_v46  ;;  %v1384_v62 = vsel %vm1257_vm4, %v637_v30, %v1383_v52  ;;  %v568_v3 = vsel %vm546_vm12, %v2547_v2, -inf }
  0x69   : > { %v658_v60 = vmax.f32 %v656_v51, %v657_v47  ;;  %v1385_v58 = vsel %vm1259_vm5, %v644_v25, %v1384_v62  ;;  %v551_v5 = vmax.f32 %v549_v13, %v550_v61  ;;  %v557_v37 = vrot.slane %v556_v53, 2 }
  0x6a   : > { %v564_v6 = vrot.slane %v563_v54, 2  ;;  %v1386_v36 = vsel %vm1261_vm6, %v651_v57, %v1385_v58  ;;  %v569_v44 = vrot.slane %v568_v3, 4  ;;  %v575_v7 = vsel %vm546_vm12, %v2556_v10, -inf }
  0x6b   : > { %v582_v28 = vsel %vm546_vm12, %v2559_v11, -inf  ;;  %1324 = vmax.xlane.f32.xlu0 %v2707_v45  ;;  %1334 = vmax.xlane.f32.xlu1 %v2740_v32  ;;  %v2771_v2 = vsel %vm1263_vm7, %v658_v60, %v1386_v36  ;;  %v552_v8 = vrot.slane %v551_v5, 1  ;;  %v558_v31 = vmax.f32 %v556_v53, %v557_v37 }
  0x6c   : > { %v565_v9 = vmax.f32 %v563_v54, %v564_v6  ;;  %v1409_v12 = vsel %vm1290_vm8, %v2771_v2, -inf  ;;  %v570_v41 = vmax.f32 %v568_v3, %v569_v44  ;;  %v576_v14 = vrot.slane %v575_v7, 4 }
  0x6d   : > { %v583_v17 = vrot.slane %v582_v28, 4  ;;  %v553_v10 = vmax.f32 %v551_v5, %v552_v8  ;;  %v559_v19 = vrot.slane %v558_v31, 1  ;;  %v589_v11 = vsel %vm546_vm12, %v2569_v24, -inf }
  0x6e   : > { %v566_v26 = vrot.slane %v565_v9, 1  ;;  %v571_v45 = vrot.slane %v570_v41, 2  ;;  %v577_v32 = vmax.f32 %v575_v7, %v576_v14  ;;  %v590_v21 = vrot.slane %v589_v11, 4 }
  0x6f   : > { %v584_v20 = vmax.f32 %v582_v28, %v583_v17  ;;  %1331 = vmax.xlane.f32.xlu0 %v2711_v48  ;;  %1340 = vmax.xlane.f32.xlu1 %v2714_v50  ;;  %v560_v38 = vmax.f32 %v558_v31, %v559_v19  ;;  %v596_v29 = vsel %vm546_vm12, %v2581_v33, -inf  ;;  %v715_v22 = vsel %vm546_vm12, %v2588_v55, -inf }
  0x70   : > { %v567_v18 = vmax.f32 %v565_v9, %v566_v26  ;;  %v572_v49 = vmax.f32 %v570_v41, %v571_v45  ;;  %v578_v23 = vrot.slane %v577_v32, 2  ;;  %v591_v24 = vmax.f32 %v589_v11, %v590_v21 }
  0x71   : > { %v585_v63 = vrot.slane %v584_v20, 2  ;;  %v597_v34 = vrot.slane %v596_v29, 4  ;;  %v1374_v51 = vsel %vm1251_vm1, %v560_v38, %v553_v10  ;;  %v716_v35 = vrot.slane %v715_v22, 4 }
  0x72   : > { %v722_v48 = vsel %vm546_vm12, %v2591_v4, -inf  ;;  %v573_v50 = vrot.slane %v572_v49, 1  ;;  %v579_v13 = vmax.f32 %v577_v32, %v578_v23  ;;  %v592_v43 = vrot.slane %v591_v24, 2 }
  0x73   : > { %v586_v42 = vmax.f32 %v584_v20, %v585_v63  ;;  %1337 = vmax.xlane.f32.xlu0 %v2719_v56  ;;  %1410 = vmax.xlane.f32.xlu1 %v1409_v12  ;;  %v598_v33 = vmax.f32 %v596_v29, %v597_v34  ;;  %v1375_v55 = vsel %vm1253_vm2, %v567_v18, %v1374_v51  ;;  %v723_v25 = vrot.slane %v722_v48, 4 }
  0x74   : > { %v717_v30 = vmax.f32 %v715_v22, %v716_v35  ;;  %v574_v46 = vmax.f32 %v572_v49, %v573_v50  ;;  %v580_v47 = vrot.slane %v579_v13, 1  ;;  %v593_v61 = vmax.f32 %v591_v24, %v592_v43 }
  0x75   : > { %v587_v52 = vrot.slane %v586_v42, 1  ;;  %v599_v53 = vrot.slane %v598_v33, 2  ;;  %v724_v57 = vmax.f32 %v722_v48, %v723_v25  ;;  %v729_v4 = vsel %vm546_vm12, %v2598_v15, -inf }
  0x76   : > { %v718_v54 = vrot.slane %v717_v30, 2  ;;  %v581_v60 = vmax.f32 %v579_v13, %v580_v47  ;;  %v594_v3 = vrot.slane %v593_v61, 1  ;;  %v1376_v56 = vsel %vm1255_vm3, %v574_v46, %v1375_v55 }
  0x77   : > { %v588_v62 = vmax.f32 %v586_v42, %v587_v52  ;;  %v600_v58 = vmax.f32 %v598_v33, %v599_v53  ;;  %v725_v37 = vrot.slane %v724_v57, 2  ;;  %v730_v6 = vrot.slane %v729_v4, 4 }
  0x78   : > { %v719_v5 = vmax.f32 %v717_v30, %v718_v54  ;;  %v595_v36 = vmax.f32 %v593_v61, %v594_v3  ;;  %v1377_v44 = vsel %vm1257_vm4, %v581_v60, %v1376_v56  ;;  %v736_v7 = vsel %vm546_vm12, %v2601_v16, -inf }
  0x79   : > { %v743_v28 = vsel %vm546_vm12, %v2607_v27, -inf  ;;  %v601_v8 = vrot.slane %v600_v58, 1  ;;  %v1378_v15 = vsel %vm1259_vm5, %v588_v62, %v1377_v44  ;;  %v726_v9 = vmax.f32 %v724_v57, %v725_v37 }
  0x7a   : > { %v720_v31 = vrot.slane %v719_v5, 1  ;;  %v1379_v12 = vsel %vm1261_vm6, %v595_v36, %v1378_v15  ;;  %v731_v41 = vmax.f32 %v729_v4, %v730_v6  ;;  %v737_v14 = vrot.slane %v736_v7, 4 }
  0x7b   : > { %v744_v17 = vrot.slane %v743_v28, 4  ;;  %v602_v10 = vmax.f32 %v600_v58, %v601_v8  ;;  %v727_v26 = vrot.slane %v726_v9, 1  ;;  %v750_v11 = vsel %vm546_vm12, %v2616_v39, -inf  ;;  %v2418_v58 = vld [vmem:[%s2512_s19 + $0x120] sm:$0xff] }
  0x7c   : > { %v721_v19 = vmax.f32 %v719_v5, %v720_v31  ;;  %v732_v16 = vrot.slane %v731_v41, 2  ;;  %v738_v45 = vmax.f32 %v736_v7, %v737_v14  ;;  %v751_v27 = vrot.slane %v750_v11, 4  ;;  %v2419_v5 = vld [vmem:[%s2512_s19 + $0x130] sm:$0xff]  ;;  %v2420_v14 = vld [vmem:[%s2512_s19 + $0x140] sm:$0xff] }
  0x7d   : > { %v745_v32 = vmax.f32 %v743_v28, %v744_v17  ;;  %v2801_v20 = vsel %vm1263_vm7, %v602_v10, %v1379_v12  ;;  %v728_v21 = vmax.f32 %v726_v9, %v727_v26  ;;  %v757_v38 = vsel %vm546_vm12, %v2619_v40, -inf }
  0x7e   : > { %v764_v18 = vsel %vm546_vm12, %v2632_v59, -inf  ;;  %v1406_v29 = vsel %vm1290_vm8, %v2801_v20, -inf  ;;  %v733_v22 = vmax.f32 %v731_v41, %v732_v16  ;;  %v739_v49 = vrot.slane %v738_v45, 2 }
  0x7f   : > { %v746_v39 = vrot.slane %v745_v32, 2  ;;  %1407 = vmax.xlane.f32.xlu0 %v1406_v29  ;;  %v752_v23 = vmax.f32 %v750_v11, %v751_v27  ;;  %v758_v63 = vrot.slane %v757_v38, 4  ;;  %v765_v24 = vrot.slane %v764_v18, 4 }
  0x80   : > { %v1395_v34 = vsel %vm1251_vm1, %v728_v21, %v721_v19  ;;  %v734_v51 = vrot.slane %v733_v22, 1  ;;  %v740_v35 = vmax.f32 %v738_v45, %v739_v49  ;;  %v659_v40 = vsel %vm546_vm12, %v2515_v0, -inf  ;;  %v2422_v21 = vld [vmem:[%s2512_s19 + $0x160] sm:$0xff] }
  0x81   : > { %v747_v48 = vmax.f32 %v745_v32, %v746_v39  ;;  %v753_v50 = vrot.slane %v752_v23, 2  ;;  %v759_v59 = vmax.f32 %v757_v38, %v758_v63  ;;  %v766_v13 = vmax.f32 %v764_v18, %v765_v24  ;;  %v2421_v32 = vld [vmem:[%s2512_s19 + $0x150] sm:$0xff] }
  0x82   : > { %v660_v42 = vrot.slane %v659_v40, 4  ;;  %v735_v43 = vmax.f32 %v733_v22, %v734_v51  ;;  %v741_v33 = vrot.slane %v740_v35, 1  ;;  %v666_v30 = vsel %vm546_vm12, %v2518_v1, -inf }
  0x83   : > { %v748_v55 = vrot.slane %v747_v48, 1  ;;  %v754_v25 = vmax.f32 %v752_v23, %v753_v50  ;;  %v760_v46 = vrot.slane %v759_v59, 2  ;;  %v767_v47 = vrot.slane %v766_v13, 2 }
  0x84   : > { %v661_v52 = vmax.f32 %v659_v40, %v660_v42  ;;  %v742_v61 = vmax.f32 %v740_v35, %v741_v33  ;;  %v1396_v0 = vsel %vm1253_vm2, %v735_v43, %v1395_v34  ;;  %v667_v54 = vrot.slane %v666_v30, 4 }
  0x85   : > { %v749_v53 = vmax.f32 %v747_v48, %v748_v55  ;;  %v755_v57 = vrot.slane %v754_v25, 1  ;;  %v761_v4 = vmax.f32 %v759_v59, %v760_v46  ;;  %v768_v60 = vmax.f32 %v766_v13, %v767_v47  ;;  %v2423_v48 = vld [vmem:[%s2512_s19 + $0x170] sm:$0xff] }
  0x86   : > { %v662_v62 = vrot.slane %v661_v52, 2  ;;  %v1397_v3 = vsel %vm1255_vm3, %v742_v61, %v1396_v0  ;;  %v668_v56 = vmax.f32 %v666_v30, %v667_v54  ;;  %v673_v1 = vsel %vm546_vm12, %v2418_v58, -inf }
  0x87   : > { %v680_v37 = vsel %vm546_vm12, %v2419_v5, -inf  ;;  %v756_v6 = vmax.f32 %v754_v25, %v755_v57  ;;  %v762_v36 = vrot.slane %v761_v4, 1  ;;  %v769_v44 = vrot.slane %v768_v60, 1 }
  0x88   : > { %v1398_v7 = vsel %vm1257_vm4, %v749_v53, %v1397_v3  ;;  %v663_v28 = vmax.f32 %v661_v52, %v662_v62  ;;  %v669_v8 = vrot.slane %v668_v56, 2  ;;  %v674_v15 = vrot.slane %v673_v1, 4 }
  0x89   : > { %v681_v31 = vrot.slane %v680_v37, 4  ;;  %v763_v9 = vmax.f32 %v761_v4, %v762_v36  ;;  %v770_v12 = vmax.f32 %v768_v60, %v769_v44  ;;  %v1399_v41 = vsel %vm1259_vm5, %v756_v6, %v1398_v7  ;;  %v2850_v44 = vld [vmem:[%s2512_s19 + $0x88] sm:$0xff]  ;;  %v2853_v7 = vld [vmem:[%s2512_s19 + $0x98] sm:$0xff] }
  0x8a   : > { %v687_v17 = vsel %vm546_vm12, %v2420_v14, -inf  ;;  %v664_v10 = vrot.slane %v663_v28, 1  ;;  %v670_v19 = vmax.f32 %v668_v56, %v669_v8  ;;  %v675_v26 = vmax.f32 %v673_v1, %v674_v15 }
  0x8b   : > { %v682_v11 = vmax.f32 %v680_v37, %v681_v31  ;;  %v1400_v16 = vsel %vm1261_vm6, %v763_v9, %v1399_v41  ;;  %v688_v45 = vrot.slane %v687_v17, 4  ;;  %v694_v27 = vsel %vm546_vm12, %v2421_v32, -inf }
  0x8c   : > { %v701_v38 = vsel %vm546_vm12, %v2422_v21, -inf  ;;  %v1401_v18 = vsel %vm1263_vm7, %v770_v12, %v1400_v16  ;;  %v665_v29 = vmax.f32 %v663_v28, %v664_v10  ;;  %v671_v22 = vrot.slane %v670_v19, 1  ;;  %v2856_v28 = vld [vmem:[%s2512_s19 + $0xa8] sm:$0xff]  ;;  %v2870_v10 = vld [vmem:[%s2512_s19 + $0xb8] sm:$0xff] }
  0x8d   : > { %v676_v49 = vrot.slane %v675_v26, 2  ;;  %v1415_v39 = vsel %vm1290_vm8, %v1401_v18, -inf  ;;  %v683_v23 = vrot.slane %v682_v11, 2  ;;  %v689_v63 = vmax.f32 %v687_v17, %v688_v45 }
  0x8e   : > { %v695_v24 = vrot.slane %v694_v27, 4  ;;  %1416 = vmax.xlane.f32.xlu1 %v1415_v39  ;;  %v672_v34 = vmax.f32 %v670_v19, %v671_v22  ;;  %v702_v35 = vrot.slane %v701_v38, 4  ;;  %v708_v40 = vsel %vm546_vm12, %v2423_v48, -inf  ;;  %v2873_v19 = vld [vmem:[%s2512_s19 + $0xc8] sm:$0xff] }
  0x8f   : > { %v677_v51 = vmax.f32 %v675_v26, %v676_v49  ;;  %v684_v50 = vmax.f32 %v682_v11, %v683_v23  ;;  %v690_v59 = vrot.slane %v689_v63, 2  ;;  %v709_v42 = vrot.slane %v708_v40, 4  ;;  %v2889_v49 = vld [vmem:[%s2512_s19 + $0xd8] sm:$0xff]  ;;  %v2892_v39 = vld [vmem:[%s2512_s19 + $0xe8] sm:$0xff] }
  0x90   : > { %v696_v13 = vmax.f32 %v694_v27, %v695_v24  ;;  %v703_v33 = vmax.f32 %v701_v38, %v702_v35  ;;  %v1388_v55 = vsel %vm1251_vm1, %v672_v34, %v665_v29  ;;  %v1421_v30 = vsel %vm1303_vm9, %v2771_v2, -inf  ;;  %v2895_v23 = vld [vmem:[%s2512_s19 + $0xf8] sm:$0xff] }
  0x91   : > { %v678_v43 = vrot.slane %v677_v51, 1  ;;  %v685_v25 = vrot.slane %v684_v50, 1  ;;  %v691_v46 = vmax.f32 %v689_v63, %v690_v59  ;;  %v710_v52 = vmax.f32 %v708_v40, %v709_v42 }
  0x92   : > { %v697_v47 = vrot.slane %v696_v13, 2  ;;  %v704_v53 = vrot.slane %v703_v33, 2  ;;  %1422 = vmax.xlane.f32.xlu1 %v1421_v30  ;;  %v2838_v0 = vsel %vm1303_vm9, %v2801_v20, -inf  ;;  %v1427_v54 = vsel %vm1303_vm9, %v1401_v18, -inf }
  0x93   : > { %v679_v61 = vmax.f32 %v677_v51, %v678_v43  ;;  %v686_v57 = vmax.f32 %v684_v50, %v685_v25  ;;  %v692_v4 = vrot.slane %v691_v46, 1  ;;  %v711_v62 = vrot.slane %v710_v52, 2 }
  0x94   : > { %v698_v60 = vmax.f32 %v696_v13, %v697_v47  ;;  %v705_v3 = vmax.f32 %v703_v33, %v704_v53  ;;  %v1433_v58 = vsel %vm1316_vm10, %v2771_v2, -inf  ;;  %v2846_v1 = vsel %vm1316_vm10, %v2801_v20, -inf }
  0x95   : > { %v1389_v56 = vsel %vm1253_vm2, %v679_v61, %v1388_v55  ;;  %v693_v5 = vmax.f32 %v691_v46, %v692_v4  ;;  %v712_v6 = vmax.f32 %v710_v52, %v711_v62  ;;  %v1439_v15 = vsel %vm1316_vm10, %v1401_v18, -inf }
  0x96   : > { %v699_v37 = vrot.slane %v698_v60, 1  ;;  %v1390_v36 = vsel %vm1255_vm3, %v686_v57, %v1389_v56  ;;  %v706_v8 = vrot.slane %v705_v3, 1  ;;  %1428 = vmax.xlane.f32.xlu1 %v1427_v54  ;;  %v1445_v31 = vsel %vm1329_vm11, %v2771_v2, -inf }
  0x97   : > { %v2863_v9 = vsel %vm1329_vm11, %v2801_v20, -inf  ;;  %v713_v41 = vrot.slane %v712_v6, 1  ;;  %v1391_v14 = vsel %vm1257_vm4, %v693_v5, %v1390_v36  ;;  %v2867_v17 = vsel %vm1329_vm11, %v1401_v18, -inf }
  0x98   : > { %v700_v12 = vmax.f32 %v698_v60, %v699_v37  ;;  %v707_v26 = vmax.f32 %v705_v3, %v706_v8  ;;  %v827_v2 = vsel %vm321_vm0, %v2850_v44, -inf  ;;  %v834_v20 = vsel %vm321_vm0, %v2853_v7, -inf }
  0x99   : > { %v841_v11 = vsel %vm321_vm0, %v2856_v28, -inf  ;;  %v714_v16 = vmax.f32 %v712_v6, %v713_v41  ;;  %v828_v32 = vrot.slane %v827_v2, 4  ;;  %v835_v27 = vrot.slane %v834_v20, 4  ;;  %v2913_v6 = vld [vmem:[%s2512_s19 + $0x8] sm:$0xff] }
  0x9a   : > { %v1392_v45 = vsel %vm1259_vm5, %v700_v12, %v1391_v14  ;;  %1434 = vmax.xlane.f32.xlu1 %v1433_v58  ;;  %v842_v38 = vrot.slane %v841_v11, 4  ;;  %v848_v18 = vsel %vm321_vm0, %v2870_v10, -inf  ;;  %v855_v29 = vsel %vm321_vm0, %v2873_v19, -inf }
  0x9b   : > { %v1393_v21 = vsel %vm1261_vm6, %v707_v26, %v1392_v45  ;;  %v829_v63 = vmax.f32 %v827_v2, %v828_v32  ;;  %v836_v24 = vmax.f32 %v834_v20, %v835_v27  ;;  %v849_v34 = vrot.slane %v848_v18, 4  ;;  %v2916_v2 = vld [vmem:[%s2512_s19 + $0x18] sm:$0xff]  ;;  %v2919_v20 = vld [vmem:[%s2512_s19 + $0x28] sm:$0xff] }
  0x9c   : > { %v1394_v22 = vsel %vm1263_vm7, %v714_v16, %v1393_v21  ;;  %v843_v13 = vmax.f32 %v841_v11, %v842_v38  ;;  %v856_v43 = vrot.slane %v855_v29, 4  ;;  %v862_v33 = vsel %vm321_vm0, %v2889_v49, -inf }
  0x9d   : > { %v1412_v51 = vsel %vm1290_vm8, %v1394_v22, -inf  ;;  %v1424_v35 = vsel %vm1303_vm9, %v1394_v22, -inf  ;;  %v2900_v48 = vsel %vm1316_vm10, %v1394_v22, -inf  ;;  %v2903_v40 = vsel %vm1329_vm11, %v1394_v22, -inf }
  0x9e   : > { %1413 = vmax.xlane.f32.xlu0 %v1412_v51  ;;  %v830_v50 = vrot.slane %v829_v63, 2  ;;  %v837_v59 = vrot.slane %v836_v24, 2  ;;  %v850_v42 = vmax.f32 %v848_v18, %v849_v34  ;;  %1440 = vmax.xlane.f32.xlu1 %v1439_v15  ;;  %v869_v55 = vsel %vm321_vm0, %v2892_v39, -inf }
  0x9f   : > { %v876_v30 = vsel %vm321_vm0, %v2895_v23, -inf  ;;  %v844_v47 = vrot.slane %v843_v13, 2  ;;  %v857_v61 = vmax.f32 %v855_v29, %v856_v43  ;;  %v863_v53 = vrot.slane %v862_v33, 4 }
  0xa0   : > { %v831_v25 = vmax.f32 %v829_v63, %v830_v50  ;;  %v838_v46 = vmax.f32 %v836_v24, %v837_v59  ;;  %v851_v52 = vrot.slane %v850_v42, 2  ;;  %v870_v54 = vrot.slane %v869_v55, 4  ;;  %v2936_v59 = vld [vmem:[%s2512_s19 + $0x48] sm:$0xff] }
  0xa1   : > { %v877_v57 = vrot.slane %v876_v30, 4  ;;  %v845_v62 = vmax.f32 %v843_v13, %v844_v47  ;;  %v858_v56 = vrot.slane %v857_v61, 2  ;;  %v864_v58 = vmax.f32 %v862_v33, %v863_v53  ;;  %v2939_v13 = vld [vmem:[%s2512_s19 + $0x58] sm:$0xff] }
  0xa2   : > { %1419 = vmax.xlane.f32.xlu0 %v2838_v0  ;;  %v832_v4 = vrot.slane %v831_v25, 1  ;;  %v839_v60 = vrot.slane %v838_v46, 1  ;;  %v852_v3 = vmax.f32 %v850_v42, %v851_v52  ;;  %1446 = vmax.xlane.f32.xlu1 %v1445_v31  ;;  %v871_v5 = vmax.f32 %v869_v55, %v870_v54 }
  0xa3   : > { %v878_v37 = vmax.f32 %v876_v30, %v877_v57  ;;  %v846_v15 = vrot.slane %v845_v62, 1  ;;  %v859_v41 = vmax.f32 %v857_v61, %v858_v56  ;;  %v865_v14 = vrot.slane %v864_v58, 2 }
  0xa4   : > { %v833_v36 = vmax.f32 %v831_v25, %v832_v4  ;;  %v840_v8 = vmax.f32 %v838_v46, %v839_v60  ;;  %v853_v12 = vrot.slane %v852_v3, 1  ;;  %v872_v0 = vrot.slane %v871_v5, 2 }
  0xa5   : > { %v879_v26 = vrot.slane %v878_v37, 2  ;;  %v847_v31 = vmax.f32 %v845_v62, %v846_v15  ;;  %v771_v45 = vsel %vm321_vm0, %v2913_v6, -inf  ;;  %v860_v32 = vrot.slane %v859_v41, 1  ;;  %v2952_v62 = vld [vmem:[%s2512_s19 + $0x68] sm:$0xff] }
  0xa6   : > { %1425 = vmax.xlane.f32.xlu0 %v1424_v35  ;;  %v854_v11 = vmax.f32 %v852_v3, %v853_v12  ;;  %v1493_v16 = vsel %vm1251_vm1, %v840_v8, %v833_v36  ;;  %1452 = vmax.xlane.f32.xlu1 %v2867_v17  ;;  %v866_v27 = vmax.f32 %v864_v58, %v865_v14  ;;  %v772_v29 = vrot.slane %v771_v45, 4  ;;  %v2931_v17 = vld [vmem:[%s2512_s19 + $0x38] sm:$0xff] }
  0xa7   : > { %v873_v21 = vmax.f32 %v871_v5, %v872_v0  ;;  %v880_v38 = vmax.f32 %v878_v37, %v879_v26  ;;  %v1494_v18 = vsel %vm1253_vm2, %v847_v31, %v1493_v16  ;;  %v778_v22 = vsel %vm321_vm0, %v2916_v2, -inf  ;;  %v2960_v12 = vld [vmem:[%s2512_s19 + $0x78] sm:$0xff] }
  0xa8   : > { %v785_v63 = vsel %vm321_vm0, %v2919_v20, -inf  ;;  %v861_v24 = vmax.f32 %v859_v41, %v860_v32  ;;  %v867_v34 = vrot.slane %v866_v27, 1  ;;  %v1495_v50 = vsel %vm1255_vm3, %v854_v11, %v1494_v18 }
  0xa9   : > { %v874_v51 = vrot.slane %v873_v21, 1  ;;  %v881_v35 = vrot.slane %v880_v38, 1  ;;  %v773_v42 = vmax.f32 %v771_v45, %v772_v29  ;;  %v779_v43 = vrot.slane %v778_v22, 4 }
  0xaa   : > { %1431 = vmax.xlane.f32.xlu0 %v2846_v1  ;;  %v786_v33 = vrot.slane %v785_v63, 4  ;;  %v868_v55 = vmax.f32 %v866_v27, %v867_v34  ;;  %v1496_v46 = vsel %vm1257_vm4, %v861_v24, %v1495_v50  ;;  %v792_v1 = vsel %vm321_vm0, %v2931_v17, -inf }
  0xab   : > { %v875_v30 = vmax.f32 %v873_v21, %v874_v51  ;;  %v882_v25 = vmax.f32 %v880_v38, %v881_v35  ;;  %v774_v47 = vrot.slane %v773_v42, 2  ;;  %v780_v52 = vmax.f32 %v778_v22, %v779_v43  ;;  %v2966_v21 = vld [vmem:[%s2512_s19 + $0x188] sm:$0xff] }
  0xac   : > { %v787_v61 = vmax.f32 %v785_v63, %v786_v33  ;;  %v1497_v53 = vsel %vm1259_vm5, %v868_v55, %v1496_v46  ;;  %v793_v54 = vrot.slane %v792_v1, 4  ;;  %v799_v57 = vsel %vm321_vm0, %v2936_v59, -inf }
  0xad   : > { %v806_v4 = vsel %vm321_vm0, %v2939_v13, -inf  ;;  %v1498_v60 = vsel %vm1261_vm6, %v875_v30, %v1497_v53  ;;  %v775_v3 = vmax.f32 %v773_v42, %v774_v47  ;;  %v781_v56 = vrot.slane %v780_v52, 2  ;;  %v2971_v42 = vld [vmem:[%s2512_s19 + $0x198] sm:$0xff] }
  0xae   : > { %1437 = vmax.xlane.f32.xlu0 %v2900_v48  ;;  %v788_v58 = vrot.slane %v787_v61, 2  ;;  %v2955_v5 = vsel %vm1263_vm7, %v882_v25, %v1498_v60  ;;  %v794_v37 = vmax.f32 %v792_v1, %v793_v54  ;;  %v800_v36 = vrot.slane %v799_v57, 4  ;;  %v2979_v1 = vld [vmem:[%s2512_s19 + $0x1a8] sm:$0xff] }
  0xaf   : > { %v807_v8 = vrot.slane %v806_v4, 4  ;;  %v1521_v15 = vsel %vm1290_vm8, %v2955_v5, -inf  ;;  %v776_v48 = vrot.slane %v775_v3, 1  ;;  %v782_v41 = vmax.f32 %v780_v52, %v781_v56 }
  0xb0   : > { %v789_v14 = vmax.f32 %v787_v61, %v788_v58  ;;  %1522 = vmax.xlane.f32.xlu1 %v1521_v15  ;;  %v795_v0 = vrot.slane %v794_v37, 2  ;;  %v801_v26 = vmax.f32 %v799_v57, %v800_v36  ;;  %v813_v11 = vsel %vm321_vm0, %v2952_v62, -inf  ;;  %v2982_v57 = vld [vmem:[%s2512_s19 + $0x1b8] sm:$0xff] }
  0xb1   : > { %v808_v31 = vmax.f32 %v806_v4, %v807_v8  ;;  %v777_v16 = vmax.f32 %v775_v3, %v776_v48  ;;  %v783_v45 = vrot.slane %v782_v41, 1  ;;  %v814_v27 = vrot.slane %v813_v11, 4  ;;  %v2988_v8 = vld [vmem:[%s2512_s19 + $0x1c8] sm:$0xff] }
  0xb2   : > { %1443 = vmax.xlane.f32.xlu0 %v2863_v9  ;;  %v790_v32 = vrot.slane %v789_v14, 1  ;;  %v796_v38 = vmax.f32 %v794_v37, %v795_v0  ;;  %v802_v18 = vrot.slane %v801_v26, 2  ;;  %v820_v22 = vsel %vm321_vm0, %v2960_v12, -inf }
  0xb3   : > { %v809_v29 = vrot.slane %v808_v31, 2  ;;  %v784_v63 = vmax.f32 %v782_v41, %v783_v45  ;;  %v815_v34 = vmax.f32 %v813_v11, %v814_v27  ;;  %v821_v51 = vrot.slane %v820_v22, 4  ;;  %v2997_v45 = vld [vmem:[%s2512_s19 + $0x1d8] sm:$0xff] }
  0xb4   : > { %v791_v24 = vmax.f32 %v789_v14, %v790_v32  ;;  %v797_v35 = vrot.slane %v796_v38, 1  ;;  %v803_v9 = vmax.f32 %v801_v26, %v802_v18  ;;  %v939_v43 = vsel %vm321_vm0, %v2966_v21, -inf }
  0xb5   : > { %v810_v50 = vmax.f32 %v808_v31, %v809_v29  ;;  %v816_v33 = vrot.slane %v815_v34, 2  ;;  %v822_v55 = vmax.f32 %v820_v22, %v821_v51  ;;  %v1486_v30 = vsel %vm1251_vm1, %v784_v63, %v777_v16  ;;  %v3003_v51 = vld [vmem:[%s2512_s19 + $0x1e8] sm:$0xff] }
  0xb6   : > { %1449 = vmax.xlane.f32.xlu0 %v2903_v40  ;;  %v940_v25 = vrot.slane %v939_v43, 4  ;;  %v798_v46 = vmax.f32 %v796_v38, %v797_v35  ;;  %v804_v47 = vrot.slane %v803_v9, 1  ;;  %v1487_v61 = vsel %vm1253_vm2, %v791_v24, %v1486_v30  ;;  %v3006_v35 = vld [vmem:[%s2512_s19 + $0x1f8] sm:$0xff] }
  0xb7   : > { %v811_v52 = vrot.slane %v810_v50, 1  ;;  %v817_v53 = vmax.f32 %v815_v34, %v816_v33  ;;  %v823_v54 = vrot.slane %v822_v55, 2  ;;  %v946_v40 = vsel %vm321_vm0, %v2971_v42, -inf }
  0xb8   : > { %v941_v4 = vmax.f32 %v939_v43, %v940_v25  ;;  %v805_v60 = vmax.f32 %v803_v9, %v804_v47  ;;  %v1488_v56 = vsel %vm1255_vm3, %v798_v46, %v1487_v61  ;;  %v947_v58 = vrot.slane %v946_v40, 4 }
  0xb9   : > { %v812_v3 = vmax.f32 %v810_v50, %v811_v52  ;;  %v818_v37 = vrot.slane %v817_v53, 1  ;;  %v824_v36 = vmax.f32 %v822_v55, %v823_v54  ;;  %v953_v48 = vsel %vm321_vm0, %v2979_v1, -inf  ;;  %v3016_v54 = vld [vmem:[%s2512_s19 + $0x108] sm:$0xff] }
  0xba   : > { %v942_v15 = vrot.slane %v941_v4, 2  ;;  %v1489_v41 = vsel %vm1257_vm4, %v805_v60, %v1488_v56  ;;  %v948_v14 = vmax.f32 %v946_v40, %v947_v58  ;;  %v954_v0 = vrot.slane %v953_v48, 4 }
  0xbb   : > { %v960_v26 = vsel %vm321_vm0, %v2982_v57, -inf  ;;  %v819_v31 = vmax.f32 %v817_v53, %v818_v37  ;;  %v825_v11 = vrot.slane %v824_v36, 1  ;;  %v1490_v16 = vsel %vm1259_vm5, %v812_v3, %v1489_v41 }
  0xbc   : > { %v943_v32 = vmax.f32 %v941_v4, %v942_v15  ;;  %v949_v27 = vrot.slane %v948_v14, 2  ;;  %v955_v38 = vmax.f32 %v953_v48, %v954_v0  ;;  %v961_v18 = vrot.slane %v960_v26, 4 }
  0xbd   : > { %v967_v29 = vsel %vm321_vm0, %v2988_v8, -inf  ;;  %v826_v22 = vmax.f32 %v824_v36, %v825_v11  ;;  %v1491_v63 = vsel %vm1261_vm6, %v819_v31, %v1490_v16  ;;  %v974_v33 = vsel %vm321_vm0, %v2997_v45, -inf }
  0xbe   : > { %v944_v24 = vrot.slane %v943_v32, 1  ;;  %v968_v34 = vrot.slane %v967_v29, 4  ;;  %v950_v9 = vmax.f32 %v948_v14, %v949_v27  ;;  %v956_v50 = vrot.slane %v955_v38, 2  ;;  %v3023_v14 = vld [vmem:[%s2512_s19 + $0x118] sm:$0xff] }
  0xbf   : > { %v962_v43 = vmax.f32 %v960_v26, %v961_v18  ;;  %v3011_v55 = vsel %vm1263_vm7, %v826_v22, %v1491_v63  ;;  %v975_v46 = vrot.slane %v974_v33, 4  ;;  %v981_v60 = vsel %vm321_vm0, %v3003_v51, -inf  ;;  %v3029_v18 = vld [vmem:[%s2512_s19 + $0x128] sm:$0xff] }
  0xc0   : > { %v945_v30 = vmax.f32 %v943_v32, %v944_v24  ;;  %v969_v25 = vmax.f32 %v967_v29, %v968_v34  ;;  %v1518_v47 = vsel %vm1290_vm8, %v3011_v55, -inf  ;;  %v951_v52 = vrot.slane %v950_v9, 1 }
  0xc1   : > { %v957_v61 = vmax.f32 %v955_v38, %v956_v50  ;;  %v963_v53 = vrot.slane %v962_v43, 2  ;;  %1519 = vmax.xlane.f32.xlu0 %v1518_v47  ;;  %v976_v40 = vmax.f32 %v974_v33, %v975_v46  ;;  %v988_v3 = vsel %vm321_vm0, %v3006_v35, -inf  ;;  %v3035_v33 = vld [vmem:[%s2512_s19 + $0x138] sm:$0xff] }
  0xc2   : > { %v970_v4 = vrot.slane %v969_v25, 2  ;;  %v952_v56 = vmax.f32 %v950_v9, %v951_v52  ;;  %v982_v36 = vrot.slane %v981_v60, 4  ;;  %v989_v41 = vrot.slane %v988_v3, 4 }
  0xc3   : > { %v958_v58 = vrot.slane %v957_v61, 1  ;;  %v964_v37 = vmax.f32 %v962_v43, %v963_v53  ;;  %v977_v48 = vrot.slane %v976_v40, 2  ;;  %v883_v0 = vsel %vm321_vm0, %v3016_v54, -inf }
  0xc4   : > { %v971_v15 = vmax.f32 %v969_v25, %v970_v4  ;;  %v983_v11 = vmax.f32 %v981_v60, %v982_v36  ;;  %v1507_v16 = vsel %vm1251_vm1, %v952_v56, %v945_v30  ;;  %v990_v38 = vmax.f32 %v988_v3, %v989_v41 }
  0xc5   : > { %v959_v26 = vmax.f32 %v957_v61, %v958_v58  ;;  %v965_v31 = vrot.slane %v964_v37, 1  ;;  %v978_v27 = vmax.f32 %v976_v40, %v977_v48  ;;  %v884_v29 = vrot.slane %v883_v0, 4  ;;  %v3042_v40 = vld [vmem:[%s2512_s19 + $0x148] sm:$0xff]  ;;  %v3048_v48 = vld [vmem:[%s2512_s19 + $0x158] sm:$0xff] }
  0xc6   : > { %v972_v32 = vrot.slane %v971_v15, 1  ;;  %v984_v63 = vrot.slane %v983_v11, 2  ;;  %v890_v34 = vsel %vm321_vm0, %v3023_v14, -inf  ;;  %v991_v43 = vrot.slane %v990_v38, 2 }
  0xc7   : > { %v966_v22 = vmax.f32 %v964_v37, %v965_v31  ;;  %v1508_v24 = vsel %vm1253_vm2, %v959_v26, %v1507_v16  ;;  %v979_v50 = vrot.slane %v978_v27, 1  ;;  %v885_v30 = vmax.f32 %v883_v0, %v884_v29 }
  0xc8   : > { %v973_v9 = vmax.f32 %v971_v15, %v972_v32  ;;  %v985_v25 = vmax.f32 %v983_v11, %v984_v63  ;;  %v891_v47 = vrot.slane %v890_v34, 4  ;;  %v897_v52 = vsel %vm321_vm0, %v3029_v18, -inf  ;;  %v3054_v63 = vld [vmem:[%s2512_s19 + $0x168] sm:$0xff] }
  0xc9   : > { %v1509_v46 = vsel %vm1255_vm3, %v966_v22, %v1508_v24  ;;  %v980_v61 = vmax.f32 %v978_v27, %v979_v50  ;;  %v992_v53 = vmax.f32 %v990_v38, %v991_v43  ;;  %v886_v60 = vrot.slane %v885_v30, 2  ;;  %v3057_v24 = vld [vmem:[%s2512_s19 + $0x178] sm:$0xff]  ;;  %s2454_s19 = smov 121  }
  0xca   : > { %v1510_v4 = vsel %vm1257_vm4, %v973_v9, %v1509_v46  ;;  %v986_v3 = vrot.slane %v985_v25, 1  ;;  %v892_v56 = vmax.f32 %v890_v34, %v891_v47  ;;  %v898_v58 = vrot.slane %v897_v52, 4 }
  0xcb   : > { %v904_v37 = vsel %vm321_vm0, %v3035_v33, -inf  ;;  %v993_v36 = vrot.slane %v992_v53, 1  ;;  %v1511_v15 = vsel %vm1259_vm5, %v980_v61, %v1510_v4  ;;  %v887_v41 = vmax.f32 %v885_v30, %v886_v60 }
  0xcc   : > { %v905_v0 = vrot.slane %v904_v37, 4  ;;  %v987_v26 = vmax.f32 %v985_v25, %v986_v3  ;;  %v893_v31 = vrot.slane %v892_v56, 2  ;;  %v899_v11 = vmax.f32 %v897_v52, %v898_v58 }
  0xcd   : > { %v911_v16 = vsel %vm321_vm0, %v3042_v40, -inf  ;;  %v994_v32 = vmax.f32 %v992_v53, %v993_v36  ;;  %v888_v27 = vrot.slane %v887_v41, 1  ;;  %v918_v50 = vsel %vm321_vm0, %v3048_v48, -inf }
  0xce   : > { %v906_v38 = vmax.f32 %v904_v37, %v905_v0  ;;  %v912_v29 = vrot.slane %v911_v16, 4  ;;  %v1512_v22 = vsel %vm1261_vm6, %v987_v26, %v1511_v15  ;;  %v894_v34 = vmax.f32 %v892_v56, %v893_v31 }
  0xcf   : > { %v900_v9 = vrot.slane %v899_v11, 2  ;;  %v1513_v43 = vsel %vm1263_vm7, %v994_v32, %v1512_v22  ;;  %v889_v30 = vmax.f32 %v887_v41, %v888_v27  ;;  %v919_v53 = vrot.slane %v918_v50, 4 }
  0xd0   : > { %v907_v25 = vrot.slane %v906_v38, 2  ;;  %v913_v46 = vmax.f32 %v911_v16, %v912_v29  ;;  %v1527_v47 = vsel %vm1290_vm8, %v1513_v43, -inf  ;;  %v895_v52 = vrot.slane %v894_v34, 1 }
  0xd1   : > { %v901_v61 = vmax.f32 %v899_v11, %v900_v9  ;;  %1528 = vmax.xlane.f32.xlu1 %v1527_v47  ;;  %v925_v3 = vsel %vm321_vm0, %v3054_v63, -inf  ;;  %v932_v56 = vsel %vm321_vm0, %v3057_v24, -inf  ;;  %v920_v36 = vmax.f32 %v918_v50, %v919_v53 }
  0xd2   : > { %v908_v4 = vmax.f32 %v906_v38, %v907_v25  ;;  %v914_v60 = vrot.slane %v913_v46, 2  ;;  %v896_v58 = vmax.f32 %v894_v34, %v895_v52  ;;  %v926_v15 = vrot.slane %v925_v3, 4 }
  0xd3   : > { %v902_v37 = vrot.slane %v901_v61, 1  ;;  %v933_v26 = vrot.slane %v932_v56, 4  ;;  %v1533_v31 = vsel %vm1303_vm9, %v2955_v5, -inf  ;;  %v921_v16 = vrot.slane %v920_v36, 2 }
  0xd4   : > { %v909_v41 = vrot.slane %v908_v4, 1  ;;  %v915_v0 = vmax.f32 %v913_v46, %v914_v60  ;;  %v927_v32 = vmax.f32 %v925_v3, %v926_v15  ;;  %v1500_v27 = vsel %vm1251_vm1, %v896_v58, %v889_v30 }
  0xd5   : > { %v903_v11 = vmax.f32 %v901_v61, %v902_v37  ;;  %v934_v22 = vmax.f32 %v932_v56, %v933_v26  ;;  %1534 = vmax.xlane.f32.xlu1 %v1533_v31  ;;  %v3072_v34 = vsel %vm1303_vm9, %v3011_v55, -inf  ;;  %v922_v9 = vmax.f32 %v920_v36, %v921_v16 }
  0xd6   : > { %v910_v38 = vmax.f32 %v908_v4, %v909_v41  ;;  %v916_v29 = vrot.slane %v915_v0, 1  ;;  %v928_v50 = vrot.slane %v927_v32, 2  ;;  %v1539_v46 = vsel %vm1303_vm9, %v1513_v43, -inf }
  0xd7   : > { %v1501_v25 = vsel %vm1253_vm2, %v903_v11, %v1500_v27  ;;  %v935_v52 = vrot.slane %v934_v22, 2  ;;  %v1545_v30 = vsel %vm1316_vm10, %v2955_v5, -inf  ;;  %v923_v53 = vrot.slane %v922_v9, 1 }
  0xd8   : > { %v917_v47 = vmax.f32 %v915_v0, %v916_v29  ;;  %v1502_v61 = vsel %vm1255_vm3, %v910_v38, %v1501_v25  ;;  %v929_v4 = vmax.f32 %v927_v32, %v928_v50  ;;  %v3081_v60 = vsel %vm1316_vm10, %v3011_v55, -inf }
  0xd9   : > { %v1551_v3 = vsel %vm1316_vm10, %v1513_v43, -inf  ;;  %v936_v56 = vmax.f32 %v934_v22, %v935_v52  ;;  %1540 = vmax.xlane.f32.xlu1 %v1539_v46  ;;  %v1557_v37 = vsel %vm1329_vm11, %v2955_v5, -inf  ;;  %v3089_v36 = vsel %vm1329_vm11, %v3011_v55, -inf }
  0xda   : > { %v1503_v58 = vsel %vm1257_vm4, %v917_v47, %v1502_v61  ;;  %v924_v15 = vmax.f32 %v922_v9, %v923_v53  ;;  %v930_v41 = vrot.slane %v929_v4, 1  ;;  %v3092_v0 = vsel %vm1329_vm11, %v1513_v43, -inf }
  0xdb   : > { %v1051_v26 = vsel %vm546_vm12, %v2850_v44, -inf  ;;  %v937_v31 = vrot.slane %v936_v56, 1  ;;  %v1058_v16 = vsel %vm546_vm12, %v2853_v7, -inf  ;;  %v1065_v5 = vsel %vm546_vm12, %v2856_v28, -inf }
  0xdc   : > { %v1052_v11 = vrot.slane %v1051_v26, 4  ;;  %v931_v32 = vmax.f32 %v929_v4, %v930_v41  ;;  %v1504_v55 = vsel %vm1259_vm5, %v924_v15, %v1503_v58  ;;  %v1059_v27 = vrot.slane %v1058_v16, 4 }
  0xdd   : > { %v1066_v38 = vrot.slane %v1065_v5, 4  ;;  %v938_v29 = vmax.f32 %v936_v56, %v937_v31  ;;  %1546 = vmax.xlane.f32.xlu1 %v1545_v30  ;;  %v1072_v22 = vsel %vm546_vm12, %v2870_v10, -inf  ;;  %v1079_v44 = vsel %vm546_vm12, %v2873_v19, -inf }
  0xde   : > { %v1053_v43 = vmax.f32 %v1051_v26, %v1052_v11  ;;  %v1505_v9 = vsel %vm1261_vm6, %v931_v32, %v1504_v55  ;;  %v1060_v7 = vmax.f32 %v1058_v16, %v1059_v27  ;;  %v1073_v25 = vrot.slane %v1072_v22, 4 }
  0xdf   : > { %v1067_v50 = vmax.f32 %v1065_v5, %v1066_v38  ;;  %v1506_v28 = vsel %vm1263_vm7, %v938_v29, %v1505_v9  ;;  %v1080_v47 = vrot.slane %v1079_v44, 4  ;;  %v1086_v52 = vsel %vm546_vm12, %v2889_v49, -inf }
  0xe0   : > { %v1054_v46 = vrot.slane %v1053_v43, 2  ;;  %v1524_v61 = vsel %vm1290_vm8, %v1506_v28, -inf  ;;  %v1536_v30 = vsel %vm1303_vm9, %v1506_v28, -inf  ;;  %v3112_v10 = vsel %vm1316_vm10, %v1506_v28, -inf }
  0xe1   : > { %v3115_v19 = vsel %vm1329_vm11, %v1506_v28, -inf  ;;  %1525 = vmax.xlane.f32.xlu0 %v1524_v61  ;;  %1552 = vmax.xlane.f32.xlu1 %v1551_v3  ;;  %v1061_v4 = vrot.slane %v1060_v7, 2  ;;  %v1068_v56 = vrot.slane %v1067_v50, 2  ;;  %v1074_v58 = vmax.f32 %v1072_v22, %v1073_v25 }
  0xe2   : > { %v1055_v53 = vmax.f32 %v1053_v43, %v1054_v46  ;;  %v1081_v15 = vmax.f32 %v1079_v44, %v1080_v47  ;;  %v1087_v41 = vrot.slane %v1086_v52, 4  ;;  %v1093_v49 = vsel %vm546_vm12, %v2892_v39, -inf  ;;  %v3122_v44 = vpop.xlane.xlu1 %1298 }
  0xe3   : > { %v1100_v26 = vsel %vm546_vm12, %v2895_v23, -inf  ;;  %v1062_v11 = vmax.f32 %v1060_v7, %v1061_v4  ;;  %v1069_v16 = vmax.f32 %v1067_v50, %v1068_v56  ;;  %v1075_v5 = vrot.slane %v1074_v58, 2 }
  0xe4   : > { %v1056_v31 = vrot.slane %v1055_v53, 1  ;;  %v1082_v32 = vrot.slane %v1081_v15, 2  ;;  %v1088_v55 = vmax.f32 %v1086_v52, %v1087_v41  ;;  %v1094_v27 = vrot.slane %v1093_v49, 4 }
  0xe5   : > { %v1101_v3 = vrot.slane %v1100_v26, 4  ;;  %1531 = vmax.xlane.f32.xlu0 %v3072_v34  ;;  %1558 = vmax.xlane.f32.xlu1 %v1557_v37  ;;  %v1063_v29 = vrot.slane %v1062_v11, 1  ;;  %v1070_v43 = vrot.slane %v1069_v16, 1  ;;  %v1076_v22 = vmax.f32 %v1074_v58, %v1075_v5 }
  0xe6   : > { %v1057_v38 = vmax.f32 %v1055_v53, %v1056_v31  ;;  %v1083_v39 = vmax.f32 %v1081_v15, %v1082_v32  ;;  %v1089_v9 = vrot.slane %v1088_v55, 2  ;;  %v1095_v23 = vmax.f32 %v1093_v49, %v1094_v27 }
  0xe7   : > { %v1102_v25 = vmax.f32 %v1100_v26, %v1101_v3  ;;  %v1064_v7 = vmax.f32 %v1062_v11, %v1063_v29  ;;  %v1071_v50 = vmax.f32 %v1069_v16, %v1070_v43  ;;  %v1077_v28 = vrot.slane %v1076_v22, 1  ;;  %v3133_v11 = vpop.xlane.xlu1 %1301 }
  0xe8   : > { %v995_v46 = vsel %vm546_vm12, %v2913_v6, -inf  ;;  %v1084_v47 = vrot.slane %v1083_v39, 1  ;;  %v1090_v52 = vmax.f32 %v1088_v55, %v1089_v9  ;;  %v1096_v34 = vrot.slane %v1095_v23, 2 }
  0xe9   : > { %v1103_v37 = vrot.slane %v1102_v25, 2  ;;  %1537 = vmax.xlane.f32.xlu0 %v1536_v30  ;;  %1564 = vmax.xlane.f32.xlu1 %v3092_v0  ;;  %v1078_v61 = vmax.f32 %v1076_v22, %v1077_v28  ;;  %v1605_v53 = vsel %vm1251_vm1, %v1064_v7, %v1057_v38  ;;  %v996_v4 = vrot.slane %v995_v46, 4 }
  0xea   : > { %v1002_v56 = vsel %vm546_vm12, %v2916_v2, -inf  ;;  %v1085_v58 = vmax.f32 %v1083_v39, %v1084_v47  ;;  %v1091_v15 = vrot.slane %v1090_v52, 1  ;;  %v1097_v41 = vmax.f32 %v1095_v23, %v1096_v34 }
  0xeb   : > { %v1104_v49 = vmax.f32 %v1102_v25, %v1103_v37  ;;  %v1606_v6 = vsel %vm1253_vm2, %v1071_v50, %v1605_v53  ;;  %v997_v26 = vmax.f32 %v995_v46, %v996_v4  ;;  %v1003_v31 = vrot.slane %v1002_v56, 4 }
  0xec   : > { %v1009_v30 = vsel %vm546_vm12, %v2919_v20, -inf  ;;  %v1092_v0 = vmax.f32 %v1090_v52, %v1091_v15  ;;  %v1098_v16 = vrot.slane %v1097_v41, 1  ;;  %v1607_v32 = vsel %vm1255_vm3, %v1078_v61, %v1606_v6  ;;  %v3152_v52 = vpop.xlane.xlu1 %1308 }
  0xed   : > { %v1105_v5 = vrot.slane %v1104_v49, 1  ;;  %1543 = vmax.xlane.f32.xlu0 %v3081_v60  ;;  %v1608_v2 = vsel %vm1257_vm4, %v1085_v58, %v1607_v32  ;;  %v998_v55 = vrot.slane %v997_v26, 2  ;;  %v1004_v27 = vmax.f32 %v1002_v56, %v1003_v31 }
  0xee   : > { %v1010_v3 = vrot.slane %v1009_v30, 4  ;;  %v1099_v38 = vmax.f32 %v1097_v41, %v1098_v16  ;;  %v1609_v43 = vsel %vm1259_vm5, %v1092_v0, %v1608_v2  ;;  %v1016_v20 = vsel %vm546_vm12, %v2931_v17, -inf  ;;  %v3158_v41 = vpop.xlane.xlu0 %1292 }
  0xef   : > { %v1106_v29 = vmax.f32 %v1104_v49, %v1105_v5  ;;  %v999_v22 = vmax.f32 %v997_v26, %v998_v55  ;;  %v1005_v39 = vrot.slane %v1004_v27, 2  ;;  %v1017_v23 = vrot.slane %v1016_v20, 4 }
  0xf0   : > { %v1011_v9 = vmax.f32 %v1009_v30, %v1010_v3  ;;  %v1610_v25 = vsel %vm1261_vm6, %v1099_v38, %v1609_v43  ;;  %v1023_v60 = vsel %vm546_vm12, %v2936_v59, -inf  ;;  %v1030_v7 = vsel %vm546_vm12, %v2939_v13, -inf }
  0xf1   : > { %v1037_v50 = vsel %vm546_vm12, %v2952_v62, -inf  ;;  %1549 = vmax.xlane.f32.xlu0 %v3112_v10  ;;  %v3150_v28 = vsel %vm1263_vm7, %v1106_v29, %v1610_v25  ;;  %v1000_v17 = vrot.slane %v999_v22, 1  ;;  %v1006_v46 = vmax.f32 %v1004_v27, %v1005_v39 }
  0xf2   : > { %v1012_v47 = vrot.slane %v1011_v9, 2  ;;  %v1633_v34 = vsel %vm1290_vm8, %v3150_v28, -inf  ;;  %v1018_v59 = vmax.f32 %v1016_v20, %v1017_v23  ;;  %v1024_v37 = vrot.slane %v1023_v60, 4 }
  0xf3   : > { %v1031_v61 = vrot.slane %v1030_v7, 4  ;;  %1634 = vmax.xlane.f32.xlu1 %v1633_v34  ;;  %v1001_v13 = vmax.f32 %v999_v22, %v1000_v17  ;;  %v1007_v53 = vrot.slane %v1006_v46, 1  ;;  %v1038_v4 = vrot.slane %v1037_v50, 4 }
  0xf4   : > { %v1013_v62 = vmax.f32 %v1011_v9, %v1012_v47  ;;  %v1019_v10 = vrot.slane %v1018_v59, 2  ;;  %v1025_v56 = vmax.f32 %v1023_v60, %v1024_v37  ;;  %v1044_v15 = vsel %vm546_vm12, %v2960_v12, -inf  ;;  %v3164_v12 = vpop.xlane.xlu1 %1314  ;;  %v3170_v60 = vpop.xlane.xlu0 %1295 }
  0xf5   : > { %v1032_v58 = vmax.f32 %v1030_v7, %v1031_v61  ;;  %1555 = vmax.xlane.f32.xlu0 %v3089_v36  ;;  %v1008_v49 = vmax.f32 %v1006_v46, %v1007_v53  ;;  %v1039_v26 = vmax.f32 %v1037_v50, %v1038_v4  ;;  %v1045_v31 = vrot.slane %v1044_v15, 4 }
  0xf6   : > { %v1014_v6 = vrot.slane %v1013_v62, 1  ;;  %v1020_v30 = vmax.f32 %v1018_v59, %v1019_v10  ;;  %v1026_v0 = vrot.slane %v1025_v56, 2  ;;  %v1163_v5 = vsel %vm546_vm12, %v2966_v21, -inf }
  0xf7   : > { %v1033_v16 = vrot.slane %v1032_v58, 2  ;;  %v1040_v2 = vrot.slane %v1039_v26, 2  ;;  %v1046_v55 = vmax.f32 %v1044_v15, %v1045_v31  ;;  %v1598_v27 = vsel %vm1251_vm1, %v1008_v49, %v1001_v13 }
  0xf8   : > { %v1015_v32 = vmax.f32 %v1013_v62, %v1014_v6  ;;  %v1021_v3 = vrot.slane %v1020_v30, 1  ;;  %v1027_v38 = vmax.f32 %v1025_v56, %v1026_v0  ;;  %v1164_v29 = vrot.slane %v1163_v5, 4  ;;  %v3175_v53 = vpop.xlane.xlu1 %1321  ;;  %v3184_v0 = vpop.xlane.xlu0 %1305 }
  0xf9   : > { %v1034_v36 = vmax.f32 %v1032_v58, %v1033_v16  ;;  %1561 = vmax.xlane.f32.xlu0 %v3115_v19  ;;  %v1041_v43 = vmax.f32 %v1039_v26, %v1040_v2  ;;  %v1047_v20 = vrot.slane %v1046_v55, 2  ;;  %v1170_v21 = vsel %vm546_vm12, %v2971_v42, -inf }
  0xfa   : > { %v1599_v22 = vsel %vm1253_vm2, %v1015_v32, %v1598_v27  ;;  %v1022_v39 = vmax.f32 %v1020_v30, %v1021_v3  ;;  %v1028_v9 = vrot.slane %v1027_v38, 1  ;;  %v1165_v25 = vmax.f32 %v1163_v5, %v1164_v29 }
  0xfb   : > { %v1035_v23 = vrot.slane %v1034_v36, 1  ;;  %v1042_v7 = vrot.slane %v1041_v43, 1  ;;  %v1048_v50 = vmax.f32 %v1046_v55, %v1047_v20  ;;  %v1171_v17 = vrot.slane %v1170_v21, 4 }
  0xfc   : > { %v1177_v46 = vsel %vm546_vm12, %v2979_v1, -inf  ;;  %v1029_v19 = vmax.f32 %v1027_v38, %v1028_v9  ;;  %v1600_v34 = vsel %vm1255_vm3, %v1022_v39, %v1599_v22  ;;  %v1166_v59 = vrot.slane %v1165_v25, 2 }
  0xfd   : > { %v1036_v47 = vmax.f32 %v1034_v36, %v1035_v23  ;;  %v1043_v37 = vmax.f32 %v1041_v43, %v1042_v7  ;;  %v1049_v61 = vrot.slane %v1048_v50, 1  ;;  %v1172_v42 = vmax.f32 %v1170_v21, %v1171_v17  ;;  %v3195_v43 = vpop.xlane.xlu1 %1327 }
  0xfe   : > { %v1178_v13 = vrot.slane %v1177_v46, 4  ;;  %v1601_v62 = vsel %vm1257_vm4, %v1029_v19, %v1600_v34  ;;  %v1167_v4 = vmax.f32 %v1165_v25, %v1166_v59  ;;  %v1184_v10 = vsel %vm546_vm12, %v2982_v57, -inf  ;;  %v3201_v19 = vpop.xlane.xlu0 %1311 }
  0xff   : > { %v1191_v1 = vsel %vm546_vm12, %v2988_v8, -inf  ;;  %v1050_v56 = vmax.f32 %v1048_v50, %v1049_v61  ;;  %v1602_v58 = vsel %vm1259_vm5, %v1036_v47, %v1601_v62  ;;  %v1173_v15 = vrot.slane %v1172_v42, 2 }
 0x100   : > { %v1179_v49 = vmax.f32 %v1177_v46, %v1178_v13  ;;  %v1603_v6 = vsel %vm1261_vm6, %v1043_v37, %v1602_v58  ;;  %v1168_v26 = vrot.slane %v1167_v4, 1  ;;  %v1185_v31 = vrot.slane %v1184_v10, 4 }
 0x101   : > { %v1192_v30 = vrot.slane %v1191_v1, 4  ;;  %v3187_v16 = vsel %vm1263_vm7, %v1050_v56, %v1603_v6  ;;  %v1174_v5 = vmax.f32 %v1172_v42, %v1173_v15  ;;  %v1198_v8 = vsel %vm546_vm12, %v2997_v45, -inf }
 0x102   : > { %v1180_v57 = vrot.slane %v1179_v49, 2  ;;  %v1630_v32 = vsel %vm1290_vm8, %v3187_v16, -inf  ;;  %v1169_v2 = vmax.f32 %v1167_v4, %v1168_v26  ;;  %v1186_v55 = vmax.f32 %v1184_v10, %v1185_v31 }
 0x103   : > { %v1193_v27 = vmax.f32 %v1191_v1, %v1192_v30  ;;  %1631 = vmax.xlane.f32.xlu0 %v1630_v32  ;;  %v1175_v3 = vrot.slane %v1174_v5, 1  ;;  %v1199_v36 = vrot.slane %v1198_v8, 4  ;;  %v1205_v29 = vsel %vm546_vm12, %v3003_v51, -inf  ;;  %v3207_v1 = vpop.xlane.xlu1 %1334  ;;  %v3212_v32 = vpop.xlane.xlu0 %1318 }
 0x104   : > { %v1181_v38 = vmax.f32 %v1179_v49, %v1180_v57  ;;  %v1187_v20 = vrot.slane %v1186_v55, 2  ;;  %v1206_v21 = vrot.slane %v1205_v29, 4  ;;  %v1212_v45 = vsel %vm546_vm12, %v3006_v35, -inf }
 0x105   : > { %v1194_v22 = vrot.slane %v1193_v27, 2  ;;  %v1176_v39 = vmax.f32 %v1174_v5, %v1175_v3  ;;  %v1200_v23 = vmax.f32 %v1198_v8, %v1199_v36  ;;  %v1213_v25 = vrot.slane %v1212_v45, 4 }
 0x106   : > { %v1182_v9 = vrot.slane %v1181_v38, 1  ;;  %v1188_v7 = vmax.f32 %v1186_v55, %v1187_v20  ;;  %v1207_v17 = vmax.f32 %v1205_v29, %v1206_v21  ;;  %v1107_v46 = vsel %vm546_vm12, %v3016_v54, -inf }
 0x107   : > { %v1195_v50 = vmax.f32 %v1193_v27, %v1194_v22  ;;  %v1201_v47 = vrot.slane %v1200_v23, 2  ;;  %v1214_v34 = vmax.f32 %v1212_v45, %v1213_v25  ;;  %v1619_v59 = vsel %vm1251_vm1, %v1176_v39, %v1169_v2  ;;  %v3218_v45 = vpop.xlane.xlu1 %1340 }
 0x108   : > { %v1183_v51 = vmax.f32 %v1181_v38, %v1182_v9  ;;  %v1189_v37 = vrot.slane %v1188_v7, 1  ;;  %v1208_v35 = vrot.slane %v1207_v17, 2  ;;  %v1108_v42 = vrot.slane %v1107_v46, 4 }
 0x109   : > { %v1196_v61 = vrot.slane %v1195_v50, 1  ;;  %v1202_v13 = vmax.f32 %v1200_v23, %v1201_v47  ;;  %v1215_v62 = vrot.slane %v1214_v34, 2  ;;  %v1114_v10 = vsel %vm546_vm12, %v3023_v14, -inf }
 0x10a   : > { %v1620_v4 = vsel %vm1253_vm2, %v1183_v51, %v1619_v59  ;;  %v1190_v54 = vmax.f32 %v1188_v7, %v1189_v37  ;;  %v1209_v58 = vmax.f32 %v1207_v17, %v1208_v35  ;;  %v1109_v15 = vmax.f32 %v1107_v46, %v1108_v42  ;;  %v3230_v59 = vpop.xlane.xlu0 %1324 }
 0x10b   : > { %v1197_v56 = vmax.f32 %v1195_v50, %v1196_v61  ;;  %v1203_v49 = vrot.slane %v1202_v13, 1  ;;  %v1216_v6 = vmax.f32 %v1214_v34, %v1215_v62  ;;  %v1115_v26 = vrot.slane %v1114_v10, 4 }
 0x10c   : > { %v1121_v31 = vsel %vm546_vm12, %v3029_v18, -inf  ;;  %v1210_v30 = vrot.slane %v1209_v58, 1  ;;  %v1621_v5 = vsel %vm1255_vm3, %v1190_v54, %v1620_v4  ;;  %v1110_v57 = vrot.slane %v1109_v15, 2 }
 0x10d   : > { %v1122_v8 = vrot.slane %v1121_v31, 4  ;;  %v1204_v14 = vmax.f32 %v1202_v13, %v1203_v49  ;;  %v1217_v2 = vrot.slane %v1216_v6, 1  ;;  %v1622_v55 = vsel %vm1257_vm4, %v1197_v56, %v1621_v5 }
 0x10e   : > { %v1116_v27 = vmax.f32 %v1114_v10, %v1115_v26  ;;  %v1211_v3 = vmax.f32 %v1209_v58, %v1210_v30  ;;  %v1111_v38 = vmax.f32 %v1109_v15, %v1110_v57  ;;  %v1128_v29 = vsel %vm546_vm12, %v3035_v33, -inf  ;;  %v3238_v58 = vpop.xlane.xlu1 %1410 }
 0x10f   : > { %v1123_v36 = vmax.f32 %v1121_v31, %v1122_v8  ;;  %v1218_v20 = vmax.f32 %v1216_v6, %v1217_v2  ;;  %v1623_v18 = vsel %vm1259_vm5, %v1204_v14, %v1622_v55  ;;  %v1129_v21 = vrot.slane %v1128_v29, 4  ;;  %v3244_v14 = vpop.xlane.xlu0 %1331 }
 0x110   : > { %v1117_v22 = vrot.slane %v1116_v27, 2  ;;  %v1624_v39 = vsel %vm1261_vm6, %v1211_v3, %v1623_v18  ;;  %v1112_v9 = vrot.slane %v1111_v38, 1  ;;  %v1135_v25 = vsel %vm546_vm12, %v3042_v40, -inf }
 0x111   : > { %v1124_v23 = vrot.slane %v1123_v36, 2  ;;  %v3224_v7 = vsel %vm1263_vm7, %v1218_v20, %v1624_v39  ;;  %v1130_v17 = vmax.f32 %v1128_v29, %v1129_v21  ;;  %v1136_v33 = vrot.slane %v1135_v25, 4 }
 0x112   : > { %v1118_v50 = vmax.f32 %v1116_v27, %v1117_v22  ;;  %v1639_v46 = vsel %vm1290_vm8, %v3224_v7, -inf  ;;  %v1113_v51 = vmax.f32 %v1111_v38, %v1112_v9  ;;  %v1142_v34 = vsel %vm546_vm12, %v3048_v48, -inf }
 0x113   : > { %v1125_v47 = vmax.f32 %v1123_v36, %v1124_v23  ;;  %1640 = vmax.xlane.f32.xlu1 %v1639_v46  ;;  %v1131_v61 = vrot.slane %v1130_v17, 2  ;;  %v1137_v40 = vmax.f32 %v1135_v25, %v1136_v33  ;;  %v1143_v35 = vrot.slane %v1142_v34, 4 }
 0x114   : > { %v1119_v37 = vrot.slane %v1118_v50, 1  ;;  %v1149_v13 = vsel %vm546_vm12, %v3054_v63, -inf  ;;  %v1156_v62 = vsel %vm546_vm12, %v3057_v24, -inf  ;;  %v1645_v4 = vsel %vm1303_vm9, %v3150_v28, -inf }
 0x115   : > { %v1126_v42 = vrot.slane %v1125_v47, 1  ;;  %v1132_v54 = vmax.f32 %v1130_v17, %v1131_v61  ;;  %v1138_v48 = vrot.slane %v1137_v40, 2  ;;  %v1144_v56 = vmax.f32 %v1142_v34, %v1143_v35  ;;  %v3252_v17 = vpop.xlane.xlu0 %1337 }
 0x116   : > { %v1120_v10 = vmax.f32 %v1118_v50, %v1119_v37  ;;  %v1150_v49 = vrot.slane %v1149_v13, 4  ;;  %v1157_v6 = vrot.slane %v1156_v62, 4  ;;  %v1651_v8 = vsel %vm1303_vm9, %v3224_v7, -inf }
 0x117   : > { %v1127_v15 = vmax.f32 %v1125_v47, %v1126_v42  ;;  %v1133_v26 = vrot.slane %v1132_v54, 1  ;;  %v1139_v31 = vmax.f32 %v1137_v40, %v1138_v48  ;;  %v1145_v30 = vrot.slane %v1144_v56, 2  ;;  %1646 = vmax.xlane.f32.xlu1 %v1645_v4 }
 0x118   : > { %v1612_v63 = vsel %vm1251_vm1, %v1120_v10, %v1113_v51  ;;  %v1151_v5 = vmax.f32 %v1149_v13, %v1150_v49  ;;  %v1158_v24 = vmax.f32 %v1156_v62, %v1157_v6  ;;  %v1657_v39 = vsel %vm1316_vm10, %v3150_v28, -inf }
 0x119   : > { %v1613_v57 = vsel %vm1253_vm2, %v1127_v15, %v1612_v63  ;;  %v1134_v2 = vmax.f32 %v1132_v54, %v1133_v26  ;;  %v1140_v55 = vrot.slane %v1139_v31, 1  ;;  %v1146_v27 = vmax.f32 %v1144_v56, %v1145_v30  ;;  %v3266_v13 = vpop.xlane.xlu0 %1407 }
 0x11a   : > { %v1152_v3 = vrot.slane %v1151_v5, 2  ;;  %v1159_v38 = vrot.slane %v1158_v24, 2  ;;  %v1663_v34 = vsel %vm1316_vm10, %v3224_v7, -inf  ;;  %v1669_v42 = vsel %vm1329_vm11, %v3150_v28, -inf }
 0x11b   : > { %v1141_v36 = vmax.f32 %v1139_v31, %v1140_v55  ;;  %v1147_v29 = vrot.slane %v1146_v27, 1  ;;  %v1614_v20 = vsel %vm1255_vm3, %v1134_v2, %v1613_v57  ;;  %1652 = vmax.xlane.f32.xlu1 %v1651_v8  ;;  %v3247_v18 = vpop.xlane.xlu1 %1416  ;;  %v1642_v62 = vsel %vm1303_vm9, %v3187_v16, -inf }
 0x11c   : > { %v1153_v22 = vmax.f32 %v1151_v5, %v1152_v3  ;;  %v1160_v21 = vmax.f32 %v1158_v24, %v1159_v38  ;;  %v1675_v10 = vsel %vm1329_vm11, %v3224_v7, -inf  ;;  %v1654_v28 = vsel %vm1316_vm10, %v3187_v16, -inf }
 0x11d   : > { %v1148_v9 = vmax.f32 %v1146_v27, %v1147_v29  ;;  %v1615_v23 = vsel %vm1257_vm4, %v1141_v36, %v1614_v20  ;;  %v1679_v7 = vmax.f32 %v3170_v60, %v3152_v52  ;;  %v1691_v26 = vmax.f32 %v3175_v53, %v3207_v1 }
 0x11e   : > { %v1154_v25 = vrot.slane %v1153_v22, 1  ;;  %v1161_v50 = vrot.slane %v1160_v21, 1  ;;  %v1681_v8 = vmax.f32 %v3133_v11, %v3164_v12  ;;  %v1693_v55 = vmax.f32 %v3195_v43, %v3218_v45 }
 0x11f   : > { %v1616_v33 = vsel %vm1259_vm5, %v1148_v9, %v1615_v23  ;;  %1658 = vmax.xlane.f32.xlu1 %v1657_v39  ;;  %v3255_v46 = vpop.xlane.xlu1 %1422  ;;  %v1666_v36 = vsel %vm1329_vm11, %v3187_v16, -inf  ;;  %v1680_v29 = vmax.f32 %v3122_v44, %v3201_v19  ;;  %v3327_v39 = vld [vmem:[%s3714_s1 + $0x8] sm:$0xff] }
 0x120   : > { %v1155_v51 = vmax.f32 %v1153_v22, %v1154_v25  ;;  %v1162_v47 = vmax.f32 %v1160_v21, %v1161_v50  ;;  %v1683_v15 = vmax.f32 %v3238_v58, %v3255_v46 }
 0x122   : > { %v1617_v37 = vsel %vm1261_vm6, %v1155_v51, %v1616_v33  ;;  %v3294_v63 = vmax.f32 %v1679_v7, %v1683_v15  ;;  %v3341_v33 = vld [vmem:[%s3714_s1 + $0x10] sm:$0xff]  ;;  %v1692_v15 = vmax.f32 %v3230_v59, %v3252_v17 }
 0x123   : > { %v1618_v61 = vsel %vm1263_vm7, %v1162_v47, %v1617_v37  ;;  %1664 = vmax.xlane.f32.xlu1 %v1663_v34  ;;  %v3261_v40 = vpop.xlane.xlu1 %1428  ;;  %v1678_v37 = vmax.f32 %v3158_v41, %v3184_v0 }
 0x124   : > { %v1636_v35 = vsel %vm1290_vm8, %v1618_v61, -inf  ;;  %v1648_v54 = vsel %vm1303_vm9, %v1618_v61, -inf  ;;  %v1660_v30 = vsel %vm1316_vm10, %v1618_v61, -inf  ;;  %v1685_v5 = vmax.f32 %v3247_v18, %v3261_v40 }
 0x125   : > { %1637 = vmax.xlane.f32.xlu0 %v1636_v35  ;;  %v1755_v23 = vmul.f32 %v3327_v39, %v3294_v63  ;;  %v1672_v25 = vsel %vm1329_vm11, %v1618_v61, -inf  ;;  %v1690_v61 = vmax.f32 %v3212_v32, %v3244_v14 }
 0x126   : > { %v3318_v20 = vmax.f32 %v1681_v8, %v1685_v5 }
 0x127   : > { %1670 = vmax.xlane.f32.xlu1 %v1669_v42  ;;  %v3270_v4 = vpop.xlane.xlu1 %1434  ;;  %v3360_v42 = vld [vmem:[%s3714_s1 + $0x18] sm:$0xff] }
 0x129   : > { %1643 = vmax.xlane.f32.xlu0 %v1642_v62 }
 0x12b   : > { %v3275_v48 = vpop.xlane.xlu0 %1413  ;;  %1676 = vmax.xlane.f32.xlu1 %v1675_v10  ;;  %v3277_v56 = vpop.xlane.xlu1 %1440 }
 0x12d   : > { %1649 = vmax.xlane.f32.xlu0 %v1648_v54  ;;  %v1757_v54 = vmul.f32 %v3360_v42, %v3318_v20 }
 0x12f   : > { %v3283_v49 = vpop.xlane.xlu0 %1419  ;;  %v3285_v6 = vpop.xlane.xlu1 %1446 }
 0x130   : > { %3742 = vst [vmem:[#allocation2_spill] sm:$0xff] %v3283_v49  ;;  %3743 = vst [vmem:[#allocation3_spill] sm:$0xff] %v3285_v6  ;;  %v1695_v31 = vmax.f32 %v3270_v4, %v3285_v6  ;;  %v1682_v47 = vmax.f32 %v3266_v13, %v3283_v49 }
 0x131   : > { %1655 = vmax.xlane.f32.xlu0 %v1654_v28 }
 0x132   : > { %v3300_v57 = vmax.f32 %v1691_v26, %v1695_v31  ;;  %v3362_v62 = vmax.f32 %v1678_v37, %v1682_v47 }
 0x133   : > { %v3298_v24 = vpop.xlane.xlu0 %1425  ;;  %v3304_v2 = vpop.xlane.xlu1 %1452 }
 0x134   : > { %3744 = vst [vmem:[#allocation4_spill] sm:$0xff] %v3298_v24  ;;  %3745 = vst [vmem:[#allocation5_spill] sm:$0xff] %v3304_v2  ;;  %v1684_v27 = vmax.f32 %v3275_v48, %v3298_v24  ;;  %v1697_v38 = vmax.f32 %v3277_v56, %v3304_v2  ;;  %v1779_v31 = vmul.f32 %v3327_v39, %v3300_v57 }
 0x135   : > { %1661 = vmax.xlane.f32.xlu0 %v1660_v30 }
 0x136   : > { %v3322_v21 = vmax.f32 %v1693_v55, %v1697_v38  ;;  %v3329_v9 = vmax.f32 %v1680_v29, %v1684_v27  ;;  %v3388_v55 = vld [vmem:[%s3714_s1] sm:$0xff] }
 0x137   : > { %v3320_v22 = vpop.xlane.xlu0 %1431  ;;  %v1850_v27 = vmul.f32 %v3388_v55, %v3158_v41  ;;  %v1754_v38 = vmul.f32 %v3388_v55, %v3362_v62 }
 0x138   : > { %3746 = vst [vmem:[#allocation6_spill] sm:$0xff] %v3320_v22  ;;  %v1756_v51 = vmul.f32 %v3341_v33, %v3329_v9  ;;  %v1781_v8 = vmul.f32 %v3360_v42, %v3322_v21 }
 0x139   : > { %1667 = vmax.xlane.f32.xlu0 %v1666_v36 }
 0x13b   : > { %v3336_v50 = vpop.xlane.xlu0 %1437 }
 0x13c   : > { %3747 = vst [vmem:[#allocation7_spill] sm:$0xff] %v3336_v50  ;;  %1764 = vrot.lane.b32.xlu1 %v1755_v23, %s2448_s24 }
 0x13d   : > { %1673 = vmax.xlane.f32.xlu0 %v1672_v25  ;;  %v3400_v23 = vpop.xlane.xlu1 %1522 }
 0x13e   : > { %3750 = vst [vmem:[#allocation10_spill] sm:$0xff] %v3400_v23 }
 0x13f   : > { %v3348_v34 = vpop.xlane.xlu0 %1443 }
 0x140   : > { %3748 = vst [vmem:[#allocation8_spill] sm:$0xff] %v3348_v34  ;;  %v1694_v35 = vmax.f32 %v3320_v22, %v3348_v34  ;;  %1766 = vrot.lane.b32.xlu1 %v1756_v51, %s2448_s24 }
 0x142   : > { %v3364_v10 = vmax.f32 %v1690_v61, %v1694_v35 }
 0x143   : > { %v3368_v28 = vpop.xlane.xlu0 %1449 }
 0x144   : > { %3749 = vst [vmem:[#allocation9_spill] sm:$0xff] %v3368_v28  ;;  %v1696_v26 = vmax.f32 %v3336_v50, %v3368_v28  ;;  %1768 = vrot.lane.b32.xlu1 %v1757_v54, %s2448_s24  ;;  %v1778_v36 = vmul.f32 %v3388_v55, %v3364_v10 }
 0x146   : > { %v3379_v30 = vmax.f32 %v1692_v15, %v1696_v26 }
 0x148   : > { %1788 = vrot.lane.b32.xlu1 %v1779_v31, %s2449_s27  ;;  %v1780_v29 = vmul.f32 %v3341_v33, %v3379_v30 }
 0x14c   : > { %1792 = vrot.lane.b32.xlu1 %v1781_v8, %s2449_s27 }
 0x14e   : > { %v3406_v51 = vpop.xlane.xlu0 %1519 }
 0x153   : > { %1858 = vrot.lane.b32.xlu0 %v1850_v27, %s2450_s30 }
 0x157   : > { %1762 = vrot.lane.b32.xlu0 %v1754_v38, %s2448_s24  ;;  %s2459_s24 = smov 116  }
 0x15b   : > { %1786 = vrot.lane.b32.xlu0 %v1778_v36, %s2449_s27 }
 0x15e   : > { %v3402_v25 = vpop.xlane.xlu1 %1528 }
 0x15f   : > { %1790 = vrot.lane.b32.xlu0 %v1780_v29, %s2449_s27  ;;  %3751 = vst [vmem:[#allocation11_spill] sm:$0xff] %v3402_v25  ;;  %s2462_s27 = smov 113  }
 0x162   : > { %v3404_v41 = vpop.xlane.xlu1 %1534 }
 0x163   : > { %3752 = vst [vmem:[#allocation12_spill] sm:$0xff] %v3404_v41  ;;  %v1703_v7 = vmax.f32 %v3400_v23, %v3404_v41 }
 0x166   : > { %v3408_v47 = vpop.xlane.xlu1 %1540 }
 0x167   : > { %3753 = vst [vmem:[#allocation13_spill] sm:$0xff] %v3408_v47  ;;  %v1705_v50 = vmax.f32 %v3402_v25, %v3408_v47 }
 0x16a   : > { %v3412_v61 = vpop.xlane.xlu1 %1546 }
 0x16e   : > { %v3410_v37 = vpop.xlane.xlu0 %1525  ;;  %v3416_v54 = vpop.xlane.xlu1 %1552 }
 0x172   : > { %v3414_v35 = vpop.xlane.xlu0 %1531  ;;  %v3420_v26 = vpop.xlane.xlu1 %1558 }
 0x173   : > { %3754 = vst [vmem:[#allocation14_spill] sm:$0xff] %v3414_v35  ;;  %3755 = vst [vmem:[#allocation15_spill] sm:$0xff] %v3420_v26 }
 0x176   : > { %v3418_v15 = vpop.xlane.xlu0 %1537  ;;  %v3424_v8 = vpop.xlane.xlu1 %1564 }
 0x177   : > { %v1717_v23 = vmax.f32 %v3416_v54, %v3424_v8 }
 0x17a   : > { %v3422_v31 = vpop.xlane.xlu0 %1543 }
 0x17e   : > { %v3426_v27 = vpop.xlane.xlu0 %1549 }
 0x180   : > { %v3428_v38 = vpop.xlane.xlu1 %1634 }
 0x181   : > { %3756 = vst [vmem:[#allocation16_spill] sm:$0xff] %v3428_v38 }
 0x182   : > { %v3430_v36 = vpop.xlane.xlu0 %1555 }
 0x186   : > { %v3440_v3 = vpop.xlane.xlu0 %1561 }
 0x190   : > { %v3450_v41 = vpop.xlane.xlu0 %1631 }
 0x1a0   : > { %v3432_v29 = vpop.xlane.xlu1 %1640 }
 0x1a1   : > { %3757 = vst [vmem:[#allocation17_spill] sm:$0xff] %v3432_v29 }
 0x1a4   : > { %v3434_v5 = vpop.xlane.xlu1 %1646 }
 0x1a5   : > { %3758 = vst [vmem:[#allocation18_spill] sm:$0xff] %v3434_v5  ;;  %v1707_v16 = vmax.f32 %v3428_v38, %v3434_v5 }
 0x1a7   : > { %v1711_v28 = vmax.f32 %v1703_v7, %v1707_v16 }
 0x1a8   : > { %v3442_v34 = vpop.xlane.xlu1 %1652 }
 0x1a9   : > { %3759 = vst [vmem:[#allocation19_spill] sm:$0xff] %v3442_v34  ;;  %v1709_v22 = vmax.f32 %v3432_v29, %v3442_v34  ;;  %v1803_v2 = vmul.f32 %v3327_v39, %v1711_v28  ;;  %v1702_v34 = vmax.f32 %v3406_v51, %v3414_v35  ;;  %v1704_v35 = vmax.f32 %v3410_v37, %v3418_v15 }
 0x1ab   : > { %v1713_v24 = vmax.f32 %v1705_v50, %v1709_v22  ;;  %1812 = vrot.lane.b32.xlu1 %v1803_v2, %s2451_s4  ;;  %v1715_v22 = vmax.f32 %v3412_v61, %v3420_v26 }
 0x1ac   : > { %v3452_v5 = vpop.xlane.xlu1 %1658 }
 0x1ad   : > { %3760 = vst [vmem:[#allocation20_spill] sm:$0xff] %v3452_v5  ;;  %v1805_v16 = vmul.f32 %v3360_v42, %v1713_v24 }
 0x1af   : > { %1816 = vrot.lane.b32.xlu1 %v1805_v16, %s2451_s4 }
 0x1b0   : > { %v3456_v7 = vpop.xlane.xlu1 %1664 }
 0x1b1   : > { %3761 = vst [vmem:[#allocation21_spill] sm:$0xff] %v3456_v7 }
 0x1b2   : > { %v3458_v38 = vpop.xlane.xlu0 %1637 }
 0x1b3   : > { %3762 = vst [vmem:[#allocation22_spill] sm:$0xff] %v3458_v38 }
 0x1b4   : > { %v3460_v47 = vpop.xlane.xlu1 %1670 }
 0x1b5   : > { %3763 = vst [vmem:[#allocation23_spill] sm:$0xff] %v3460_v47  ;;  %v1719_v2 = vmax.f32 %v3452_v5, %v3460_v47 }
 0x1b6   : > { %v3466_v50 = vpop.xlane.xlu0 %1643 }
 0x1b7   : > { %3764 = vst [vmem:[#allocation24_spill] sm:$0xff] %v3466_v50  ;;  %v1706_v16 = vmax.f32 %v3450_v41, %v3466_v50  ;;  %v1723_v29 = vmax.f32 %v1715_v22, %v1719_v2 }
 0x1b8   : > { %v3472_v25 = vpop.xlane.xlu1 %1676 }
 0x1b9   : > { %3765 = vst [vmem:[#allocation25_spill] sm:$0xff] %v3472_v25  ;;  %v1710_v6 = vmax.f32 %v1702_v34, %v1706_v16  ;;  %v1731_v49 = vmax.f32 %v1711_v28, %v1723_v29  ;;  %v1721_v26 = vmax.f32 %v3456_v7, %v3472_v25  ;;  %v1827_v5 = vmul.f32 %v3327_v39, %v1723_v29 }
 0x1ba   : > { %v3478_v47 = vpop.xlane.xlu0 %1649  ;;  %v3767_v28 = vmax.f32 %v3294_v63, %v3300_v57  ;;  %v3768_v63 = vmax.f32 %v3318_v20, %v3322_v21 }
 0x1bb   : > { %3766 = vst [vmem:[#allocation26_spill] sm:$0xff] %v3478_v47  ;;  %v1708_v22 = vmax.f32 %v3458_v38, %v3478_v47  ;;  %v1802_v2 = vmul.f32 %v3388_v55, %v1710_v6  ;;  %v1725_v50 = vmax.f32 %v1717_v23, %v1721_v26  ;;  %1836 = vrot.lane.b32.xlu1 %v1827_v5, %s2452_s5  ;;  %v1743_v47 = vld [vmem:[%s3715_s2 + $0x8] sm:$0xff] }
 0x1bc   : > { %v1765_v34 = vpop.permute.xlu1 %1764  ;;  %v1735_v16 = vmax.f32 %v3767_v28, %v1731_v49 }
 0x1bd   : > { %v1712_v25 = vmax.f32 %v1704_v35, %v1708_v22  ;;  %1810 = vrot.lane.b32.xlu0 %v1802_v2, %s2451_s4  ;;  %v1733_v29 = vmax.f32 %v1713_v24, %v1725_v50  ;;  %v1829_v7 = vmul.f32 %v3360_v42, %v1725_v50  ;;  %v1745_v35 = vld [vmem:[%s3715_s2 + $0x18] sm:$0xff]  ;;  %v1851_v50 = vmul.f32 %v3327_v39, %v3170_v60 }
 0x1be   : > { %v3495_v38 = vpop.xlane.xlu0 %1655  ;;  %v1747_v23 = vmul.f32 %v3327_v39, %v1735_v16  ;;  %v1714_v16 = vmax.f32 %v3422_v31, %v3430_v36 }
 0x1bf   : > { %v1804_v5 = vmul.f32 %v3341_v33, %v1712_v25  ;;  %v1737_v49 = vmax.f32 %v3768_v63, %v1733_v29  ;;  %1840 = vrot.lane.b32.xlu1 %v1829_v7, %s2452_s5  ;;  %v1853_v7 = vmul.f32 %v3360_v42, %v3133_v11  ;;  %v1716_v11 = vmax.f32 %v3426_v27, %v3440_v3 }
 0x1c0   : > { %v1751_v57 = vadd.f32 %v1747_v23, %v1743_v47  ;;  %v1767_v24 = vpop.permute.xlu1 %1766 }
 0x1c1   : > { %1814 = vrot.lane.b32.xlu0 %v1804_v5, %s2451_s4  ;;  %v1749_v26 = vmul.f32 %v3360_v42, %v1737_v49  ;;  %v1875_v5 = vmul.f32 %v3327_v39, %v3152_v52  ;;  %v3769_v52 = vmax.f32 %v3362_v62, %v3364_v10  ;;  %v3770_v10 = vmax.f32 %v3329_v9, %v3379_v30  ;;  %s2466_s4 = smov 109  }
 0x1c2   : > { %v3510_v22 = vpop.xlane.xlu0 %1661  ;;  %v1775_v2 = vadd.f32 %v1765_v34, %v1751_v57  ;;  %v1901_v30 = vmul.f32 %v3360_v42, %v3195_v43  ;;  %v1898_v43 = vmul.f32 %v3388_v55, %v3212_v32  ;;  %v1971_v32 = vmul.f32 %v3327_v39, %v3255_v46 }
 0x1c3   : > { %v1753_v20 = vadd.f32 %v1749_v26, %v1745_v35  ;;  %1860 = vrot.lane.b32.xlu1 %v1851_v50, %s2450_s30  ;;  %v1948_v46 = vmul.f32 %v3341_v33, %v3275_v48  ;;  %v3774_v48 = vld [vmem:[#allocation5_spill] sm:$0xff] }
 0x1c4   : > { %v1769_v21 = vpop.permute.xlu1 %1768 }
 0x1c5   : > { %v3513_v47 = vadd.f32 %v1769_v21, %v1753_v20 }
 0x1c6   : > { %v3517_v28 = vpop.xlane.xlu0 %1667 }
 0x1c7   : > { %v1718_v60 = vmax.f32 %v3495_v38, %v3517_v28  ;;  %1864 = vrot.lane.b32.xlu1 %v1853_v7, %s2450_s30 }
 0x1c8   : > { %v1789_v34 = vpop.permute.xlu1 %1788 }
 0x1c9   : > { %v1722_v29 = vmax.f32 %v1714_v16, %v1718_v60  ;;  %v3524_v23 = vadd.f32 %v1789_v34, %v1775_v2  ;;  %v1877_v2 = vmul.f32 %v3360_v42, %v3164_v12  ;;  %v1899_v60 = vmul.f32 %v3327_v39, %v3175_v53 }
 0x1ca   : > { %v3528_v63 = vpop.xlane.xlu0 %1673 }
 0x1cb   : > { %v1730_v49 = vmax.f32 %v1710_v6, %v1722_v29  ;;  %v1720_v57 = vmax.f32 %v3510_v22, %v3528_v63  ;;  %v1826_v35 = vmul.f32 %v3388_v55, %v1722_v29  ;;  %1884 = vrot.lane.b32.xlu1 %v1875_v5, %s2453_s10  ;;  %v1742_v6 = vld [vmem:[%s3715_s2] sm:$0xff]  ;;  %v1852_v29 = vmul.f32 %v3341_v33, %v3122_v44 }
 0x1cc   : > { %v1923_v44 = vmul.f32 %v3327_v39, %v3207_v1  ;;  %v1900_v1 = vmul.f32 %v3341_v33, %v3230_v59  ;;  %v1973_v59 = vmul.f32 %v3360_v42, %v3261_v40 }
 0x1cd   : > { %v1724_v26 = vmax.f32 %v1716_v11, %v1720_v57  ;;  %1834 = vrot.lane.b32.xlu0 %v1826_v35, %s2452_s5  ;;  %v1734_v50 = vmax.f32 %v3769_v52, %v1730_v49  ;;  %v1874_v49 = vmul.f32 %v3388_v55, %v3184_v0  ;;  %v1925_v0 = vmul.f32 %v3360_v42, %v3218_v45  ;;  %v3771_v52 = vld [vmem:[#allocation2_spill] sm:$0xff] }
 0x1ce   : > { %v3542_v20 = vpop.permute.xlu0 %1858  ;;  %v1922_v45 = vmul.f32 %v3388_v55, %v3244_v14  ;;  %v1995_v14 = vmul.f32 %v3327_v39, %v3270_v4  ;;  %v1970_v40 = vmul.f32 %v3388_v55, %v3771_v52  ;;  %v2116_v52 = vmul.f32 %v3341_v33, %v3440_v3  ;;  %v3789_v3 = vld [vmem:[#allocation20_spill] sm:$0xff] }
 0x1cf   : > { %v1732_v21 = vmax.f32 %v1712_v25, %v1724_v26  ;;  %v1828_v7 = vmul.f32 %v3341_v33, %v1724_v26  ;;  %v1746_v16 = vmul.f32 %v3388_v55, %v1734_v50  ;;  %1888 = vrot.lane.b32.xlu1 %v1877_v2, %s2453_s10  ;;  %v1744_v25 = vld [vmem:[%s3715_s2 + $0x10] sm:$0xff]  ;;  %v1876_v26 = vmul.f32 %v3341_v33, %v3201_v19 }
 0x1d0   : > { %v1949_v19 = vmul.f32 %v3360_v42, %v3247_v18  ;;  %v1946_v18 = vmul.f32 %v3388_v55, %v3266_v13  ;;  %v3772_v13 = vld [vmem:[#allocation3_spill] sm:$0xff]  ;;  %v3773_v2 = vld [vmem:[#allocation4_spill] sm:$0xff] }
 0x1d1   : > { %1838 = vrot.lane.b32.xlu0 %v1828_v7, %s2452_s5  ;;  %v1750_v62 = vadd.f32 %v1746_v16, %v1742_v6  ;;  %v1736_v12 = vmax.f32 %v3770_v10, %v1732_v21  ;;  %v2019_v50 = vmul.f32 %v3327_v39, %v3772_v13  ;;  %v1972_v4 = vmul.f32 %v3341_v33, %v3773_v2  ;;  %v3775_v21 = vld [vmem:[#allocation6_spill] sm:$0xff]  ;;  %s2467_s5 = smov 108  }
 0x1d2   : > { %v1763_v34 = vpop.permute.xlu0 %1762  ;;  %v2021_v6 = vmul.f32 %v3360_v42, %v3774_v48  ;;  %v3776_v7 = vld [vmem:[#allocation10_spill] sm:$0xff] }
 0x1d3   : > { %v1774_v5 = vadd.f32 %v1763_v34, %v1750_v62  ;;  %v1748_v11 = vmul.f32 %v3341_v33, %v1736_v12  ;;  %1908 = vrot.lane.b32.xlu1 %v1899_v60, %s2454_s19  ;;  %v2043_v16 = vmul.f32 %v3327_v39, %v3776_v7  ;;  %v3777_v62 = vld [vmem:[#allocation7_spill] sm:$0xff]  ;;  %v3779_v34 = vld [vmem:[#allocation8_spill] sm:$0xff]  ;;  %v3790_v7 = vld [vmem:[#allocation22_spill] sm:$0xff] }
 0x1d4   : > { %v1996_v10 = vmul.f32 %v3341_v33, %v3777_v62  ;;  %v3778_v12 = vld [vmem:[#allocation11_spill] sm:$0xff] }
 0x1d5   : > { %1862 = vrot.lane.b32.xlu0 %v1852_v29, %s2450_s30  ;;  %v1752_v9 = vadd.f32 %v1748_v11, %v1744_v25  ;;  %v2045_v60 = vmul.f32 %v3360_v42, %v3778_v12  ;;  %v2018_v25 = vmul.f32 %v3388_v55, %v3779_v34  ;;  %v3780_v29 = vld [vmem:[#allocation12_spill] sm:$0xff]  ;;  %v3781_v11 = vld [vmem:[#allocation9_spill] sm:$0xff]  ;;  %s2465_s30 = smov 110  }
 0x1d6   : > { %v1787_v53 = vpop.permute.xlu0 %1786  ;;  %v3792_v34 = vld [vmem:[#allocation24_spill] sm:$0xff] }
 0x1d7   : > { %v3567_v57 = vadd.f32 %v1767_v24, %v1752_v9  ;;  %v3569_v35 = vadd.f32 %v1787_v53, %v1774_v5  ;;  %1912 = vrot.lane.b32.xlu1 %v1901_v30, %s2454_s19  ;;  %v1947_v24 = vmul.f32 %v3327_v39, %v3238_v58  ;;  %v1924_v58 = vmul.f32 %v3341_v33, %v3252_v17  ;;  %v3782_v30 = vld [vmem:[#allocation13_spill] sm:$0xff] }
 0x1d8   : > { %v1997_v17 = vmul.f32 %v3360_v42, %v3277_v56  ;;  %v1994_v56 = vmul.f32 %v3388_v55, %v3775_v21  ;;  %v2067_v5 = vmul.f32 %v3327_v39, %v3780_v29  ;;  %v2020_v9 = vmul.f32 %v3341_v33, %v3781_v11 }
 0x1d9   : > { %1882 = vrot.lane.b32.xlu0 %v1874_v49, %s2453_s10  ;;  %v2069_v53 = vmul.f32 %v3360_v42, %v3782_v30  ;;  %v2042_v49 = vmul.f32 %v3388_v55, %v3406_v51  ;;  %v3784_v51 = vld [vmem:[#allocation15_spill] sm:$0xff] }
 0x1db   : > { %1932 = vrot.lane.b32.xlu1 %v1923_v44, %s2455_s20  ;;  %v2091_v44 = vmul.f32 %v3327_v39, %v3412_v61  ;;  %v2068_v61 = vmul.f32 %v3341_v33, %v3418_v15 }
 0x1dd   : > { %1886 = vrot.lane.b32.xlu0 %v1876_v26, %s2453_s10  ;;  %v2044_v26 = vmul.f32 %v3341_v33, %v3410_v37 }
 0x1df   : > { %1936 = vrot.lane.b32.xlu1 %v1925_v0, %s2455_s20  ;;  %v2093_v0 = vmul.f32 %v3360_v42, %v3416_v54 }
 0x1e1   : > { %1906 = vrot.lane.b32.xlu0 %v1898_v43, %s2454_s19  ;;  %v3783_v43 = vld [vmem:[#allocation14_spill] sm:$0xff] }
 0x1e3   : > { %1956 = vrot.lane.b32.xlu1 %v1947_v24, %s2456_s21  ;;  %v2066_v24 = vmul.f32 %v3388_v55, %v3783_v43 }
 0x1e5   : > { %1910 = vrot.lane.b32.xlu0 %v1900_v1, %s2454_s19  ;;  %v1793_v1 = vpop.permute.xlu1 %1792 }
 0x1e7   : > { %1960 = vrot.lane.b32.xlu1 %v1949_v19, %s2456_s21  ;;  %v2115_v19 = vmul.f32 %v3327_v39, %v3784_v51  ;;  %v2188_v51 = vmul.f32 %v3341_v33, %v3510_v22 }
 0x1e9   : > { %1930 = vrot.lane.b32.xlu0 %v1922_v45, %s2455_s20  ;;  %v2117_v45 = vmul.f32 %v3360_v42, %v3424_v8  ;;  %v3786_v8 = vld [vmem:[#allocation17_spill] sm:$0xff] }
 0x1eb   : > { %1980 = vrot.lane.b32.xlu1 %v1971_v32, %s2457_s22  ;;  %v2090_v32 = vmul.f32 %v3388_v55, %v3422_v31  ;;  %v2114_v31 = vmul.f32 %v3388_v55, %v3430_v36  ;;  %v2138_v36 = vmul.f32 %v3388_v55, %v3450_v41 }
 0x1ed   : > { %1934 = vrot.lane.b32.xlu0 %v1924_v58, %s2455_s20  ;;  %v1801_v58 = vadd.f32 %v1793_v1, %v3513_v47  ;;  %v3787_v47 = vld [vmem:[#allocation18_spill] sm:$0xff] }
 0x1ef   : > { %1984 = vrot.lane.b32.xlu1 %v1973_v59, %s2457_s22 }
 0x1f1   : > { %1954 = vrot.lane.b32.xlu0 %v1946_v18, %s2456_s21  ;;  %v3785_v18 = vld [vmem:[#allocation16_spill] sm:$0xff] }
 0x1f2   : > { %v2139_v15 = vmul.f32 %v3327_v39, %v3785_v18  ;;  %v2212_v18 = vmul.f32 %v3341_v33, %v3528_v63 }
 0x1f3   : > { %2004 = vrot.lane.b32.xlu1 %v1995_v14, %s2458_s23 }
 0x1f5   : > { %1958 = vrot.lane.b32.xlu0 %v1948_v46, %s2456_s21  ;;  %v2092_v46 = vmul.f32 %v3341_v33, %v3426_v27  ;;  %v1791_v27 = vpop.permute.xlu0 %1790 }
 0x1f6   : > { %v1800_v21 = vadd.f32 %v1791_v27, %v3567_v57  ;;  %v3793_v57 = vld [vmem:[#allocation23_spill] sm:$0xff] }
 0x1f7   : > { %2008 = vrot.lane.b32.xlu1 %v1997_v17, %s2458_s23  ;;  %v2163_v17 = vmul.f32 %v3327_v39, %v3787_v47 }
 0x1f9   : > { %1978 = vrot.lane.b32.xlu0 %v1970_v40, %s2457_s22  ;;  %v3788_v40 = vld [vmem:[#allocation19_spill] sm:$0xff] }
 0x1fa   : > { %v2165_v13 = vmul.f32 %v3360_v42, %v3788_v40 }
 0x1fb   : > { %2028 = vrot.lane.b32.xlu1 %v2019_v50, %s2459_s24 }
 0x1fd   : > { %1982 = vrot.lane.b32.xlu0 %v1972_v4, %s2457_s22 }
 0x1ff   : > { %2032 = vrot.lane.b32.xlu1 %v2021_v6, %s2459_s24  ;;  %v2187_v6 = vmul.f32 %v3327_v39, %v3789_v3 }
 0x201   : > { %2002 = vrot.lane.b32.xlu0 %v1994_v56, %s2458_s23 }
 0x203   : > { %2052 = vrot.lane.b32.xlu1 %v2043_v16, %s2460_s25  ;;  %v2140_v16 = vmul.f32 %v3341_v33, %v3790_v7 }
 0x205   : > { %2006 = vrot.lane.b32.xlu0 %v1996_v10, %s2458_s23 }
 0x207   : > { %2056 = vrot.lane.b32.xlu1 %v2045_v60, %s2460_s25 }
 0x209   : > { %2026 = vrot.lane.b32.xlu0 %v2018_v25, %s2459_s24  ;;  %v2162_v25 = vmul.f32 %v3388_v55, %v3792_v34 }
 0x20b   : > { %2076 = vrot.lane.b32.xlu1 %v2067_v5, %s2461_s26  ;;  %v2211_v5 = vmul.f32 %v3327_v39, %v3793_v57 }
 0x20d   : > { %2030 = vrot.lane.b32.xlu0 %v2020_v9, %s2459_s24  ;;  %v3794_v9 = vld [vmem:[#allocation26_spill] sm:$0xff] }
 0x20e   : > { %v2164_v30 = vmul.f32 %v3341_v33, %v3794_v9 }
 0x20f   : > { %2080 = vrot.lane.b32.xlu1 %v2069_v53, %s2461_s26 }
 0x211   : > { %2050 = vrot.lane.b32.xlu0 %v2042_v49, %s2460_s25  ;;  %v3795_v49 = vld [vmem:[#allocation25_spill] sm:$0xff] }
 0x213   : > { %2100 = vrot.lane.b32.xlu1 %v2091_v44, %s2462_s27  ;;  %v2213_v44 = vmul.f32 %v3360_v42, %v3795_v49 }
 0x215   : > { %2054 = vrot.lane.b32.xlu0 %v2044_v26, %s2460_s25 }
 0x217   : > { %2104 = vrot.lane.b32.xlu1 %v2093_v0, %s2462_s27  ;;  %v2186_v0 = vmul.f32 %v3388_v55, %v3495_v38 }
 0x219   : > { %2074 = vrot.lane.b32.xlu0 %v2066_v24, %s2461_s26 }
 0x21b   : > { %2124 = vrot.lane.b32.xlu1 %v2115_v19, %s2463_s28 }
 0x21d   : > { %2078 = vrot.lane.b32.xlu0 %v2068_v61, %s2461_s26  ;;  %v1813_v37 = vpop.permute.xlu1 %1812 }
 0x21e   : > { %v1823_v54 = vadd.f32 %v1813_v37, %v3524_v23  ;;  %v2141_v23 = vmul.f32 %v3360_v42, %v3786_v8 }
 0x21f   : > { %2128 = vrot.lane.b32.xlu1 %v2117_v45, %s2463_s28 }
 0x221   : > { %2098 = vrot.lane.b32.xlu0 %v2090_v32, %s2462_s27  ;;  %v1817_v59 = vpop.permute.xlu1 %1816 }
 0x222   : > { %v1825_v14 = vadd.f32 %v1817_v59, %v1801_v58 }
 0x223   : > { %2148 = vrot.lane.b32.xlu1 %v2139_v15, %s2464_s29 }
 0x225   : > { %2102 = vrot.lane.b32.xlu0 %v2092_v46, %s2462_s27 }
 0x227   : > { %2152 = vrot.lane.b32.xlu1 %v2141_v23, %s2464_s29 }
 0x229   : > { %2122 = vrot.lane.b32.xlu0 %v2114_v31, %s2463_s28 }
 0x22b   : > { %2172 = vrot.lane.b32.xlu1 %v2163_v17, %s2465_s30 }
 0x22d   : > { %2126 = vrot.lane.b32.xlu0 %v2116_v52, %s2463_s28  ;;  %v1837_v50 = vpop.permute.xlu1 %1836 }
 0x22e   : > { %v1847_v4 = vadd.f32 %v1837_v50, %v1823_v54 }
 0x22f   : > { %v1811_v2 = vpop.permute.xlu0 %1810  ;;  %2176 = vrot.lane.b32.xlu1 %v2165_v13, %s2465_s30 }
 0x230   : > { %v1822_v48 = vadd.f32 %v1811_v2, %v3569_v35  ;;  %v3791_v35 = vld [vmem:[#allocation21_spill] sm:$0xff] }
 0x231   : > { %2146 = vrot.lane.b32.xlu0 %v2138_v36, %s2464_s29  ;;  %v1841_v56 = vpop.permute.xlu1 %1840  ;;  %v2189_v12 = vmul.f32 %v3360_v42, %v3791_v35  ;;  %v2210_v42 = vmul.f32 %v3388_v55, %v3517_v28 }
 0x232   : > { %v1849_v10 = vadd.f32 %v1841_v56, %v1825_v14 }
 0x233   : > { %v1815_v62 = vpop.permute.xlu0 %1814  ;;  %2196 = vrot.lane.b32.xlu1 %v2187_v6, %s2466_s4 }
 0x234   : > { %v1824_v41 = vadd.f32 %v1815_v62, %v1800_v21 }
 0x235   : > { %2150 = vrot.lane.b32.xlu0 %v2140_v16, %s2464_s29  ;;  %v1861_v60 = vpop.permute.xlu1 %1860 }
 0x236   : > { %v1871_v29 = vadd.f32 %v1861_v60, %v1847_v4 }
 0x237   : > { %2200 = vrot.lane.b32.xlu1 %v2189_v12, %s2466_s4 }
 0x239   : > { %2170 = vrot.lane.b32.xlu0 %v2162_v25, %s2465_s30  ;;  %v1865_v11 = vpop.permute.xlu1 %1864 }
 0x23a   : > { %v1873_v53 = vadd.f32 %v1865_v11, %v1849_v10 }
 0x23b   : > { %2220 = vrot.lane.b32.xlu1 %v2211_v5, %s2467_s5 }
 0x23d   : > { %2174 = vrot.lane.b32.xlu0 %v2164_v30, %s2465_s30  ;;  %v1885_v26 = vpop.permute.xlu1 %1884 }
 0x23e   : > { %v1895_v24 = vadd.f32 %v1885_v26, %v1871_v29 }
 0x23f   : > { %v1835_v43 = vpop.permute.xlu0 %1834  ;;  %2224 = vrot.lane.b32.xlu1 %v2213_v44, %s2467_s5 }
 0x240   : > { %v1846_v1 = vadd.f32 %v1835_v43, %v1822_v48 }
 0x241   : > { %2194 = vrot.lane.b32.xlu0 %v2186_v0, %s2466_s4  ;;  %v1889_v39 = vpop.permute.xlu1 %1888 }
 0x242   : > { %v1897_v61 = vadd.f32 %v1889_v39, %v1873_v53  ;;  %v1870_v58 = vadd.f32 %v3542_v20, %v1846_v1 }
 0x243   : > { %v1839_v19 = vpop.permute.xlu0 %1838 }
 0x244   : > { %v1848_v37 = vadd.f32 %v1839_v19, %v1824_v41 }
 0x245   : > { %2198 = vrot.lane.b32.xlu0 %v2188_v51, %s2466_s4  ;;  %v1909_v45 = vpop.permute.xlu1 %1908 }
 0x246   : > { %v1919_v32 = vadd.f32 %v1909_v45, %v1895_v24 }
 0x247   : > { %v1863_v54 = vpop.permute.xlu0 %1862 }
 0x248   : > { %v1872_v38 = vadd.f32 %v1863_v54, %v1848_v37 }
 0x249   : > { %2218 = vrot.lane.b32.xlu0 %v2210_v42, %s2467_s5  ;;  %v1913_v59 = vpop.permute.xlu1 %1912 }
 0x24a   : > { %v1921_v22 = vadd.f32 %v1913_v59, %v1897_v61 }
 0x24b   : > { %v1883_v15 = vpop.permute.xlu0 %1882 }
 0x24c   : > { %v1894_v14 = vadd.f32 %v1883_v15, %v1870_v58 }
 0x24d   : > { %2222 = vrot.lane.b32.xlu0 %v2212_v18, %s2467_s5  ;;  %v1933_v46 = vpop.permute.xlu1 %1932 }
 0x24e   : > { %v1943_v23 = vadd.f32 %v1933_v46, %v1919_v32 }
 0x24f   : > { %v1887_v8 = vpop.permute.xlu0 %1886 }
 0x250   : > { %v1896_v31 = vadd.f32 %v1887_v8, %v1872_v38 }
 0x251   : > { %v1937_v47 = vpop.permute.xlu1 %1936 }
 0x252   : > { %v1945_v28 = vadd.f32 %v1937_v47, %v1921_v22 }
 0x253   : > { %v1907_v55 = vpop.permute.xlu0 %1906 }
 0x254   : > { %v1918_v17 = vadd.f32 %v1907_v55, %v1894_v14 }
 0x255   : > { %v1957_v52 = vpop.permute.xlu1 %1956 }
 0x256   : > { %v1967_v40 = vadd.f32 %v1957_v52, %v1943_v23 }
 0x257   : > { %v1911_v27 = vpop.permute.xlu0 %1910 }
 0x258   : > { %v1920_v20 = vadd.f32 %v1911_v27, %v1896_v31 }
 0x259   : > { %v1961_v13 = vpop.permute.xlu1 %1960 }
 0x25a   : > { %v1969_v36 = vadd.f32 %v1961_v13, %v1945_v28 }
 0x25b   : > { %v1931_v50 = vpop.permute.xlu0 %1930 }
 0x25c   : > { %v1942_v33 = vadd.f32 %v1931_v50, %v1918_v17 }
 0x25d   : > { %v1981_v63 = vpop.permute.xlu1 %1980 }
 0x25e   : > { %v1991_v19 = vadd.f32 %v1981_v63, %v1967_v40 }
 0x25f   : > { %v1935_v2 = vpop.permute.xlu0 %1934 }
 0x260   : > { %v1944_v4 = vadd.f32 %v1935_v2, %v1920_v20 }
 0x261   : > { %v1985_v48 = vpop.permute.xlu1 %1984 }
 0x262   : > { %v1993_v42 = vadd.f32 %v1985_v48, %v1969_v36 }
 0x263   : > { %v1955_v3 = vpop.permute.xlu0 %1954 }
 0x264   : > { %v1966_v6 = vadd.f32 %v1955_v3, %v1942_v33 }
 0x265   : > { %v2005_v21 = vpop.permute.xlu1 %2004 }
 0x266   : > { %v2015_v37 = vadd.f32 %v2005_v21, %v1991_v19 }
 0x267   : > { %v1959_v56 = vpop.permute.xlu0 %1958 }
 0x268   : > { %v1968_v7 = vadd.f32 %v1959_v56, %v1944_v4 }
 0x269   : > { %v2009_v16 = vpop.permute.xlu1 %2008 }
 0x26a   : > { %v2017_v38 = vadd.f32 %v2009_v16, %v1993_v42 }
 0x26b   : > { %v1979_v62 = vpop.permute.xlu0 %1978 }
 0x26c   : > { %v1990_v55 = vadd.f32 %v1979_v62, %v1966_v6 }
 0x26d   : > { %v2029_v10 = vpop.permute.xlu1 %2028 }
 0x26e   : > { %v2039_v54 = vadd.f32 %v2029_v10, %v2015_v37 }
 0x26f   : > { %v1983_v41 = vpop.permute.xlu0 %1982 }
 0x270   : > { %v1992_v50 = vadd.f32 %v1983_v41, %v1968_v7 }
 0x271   : > { %v2033_v35 = vpop.permute.xlu1 %2032 }
 0x272   : > { %v2041_v18 = vadd.f32 %v2033_v35, %v2017_v38 }
 0x273   : > { %v2003_v12 = vpop.permute.xlu0 %2002 }
 0x274   : > { %v2014_v52 = vadd.f32 %v2003_v12, %v1990_v55 }
 0x275   : > { %v2053_v60 = vpop.permute.xlu1 %2052 }
 0x276   : > { %v2063_v58 = vadd.f32 %v2053_v60, %v2039_v54 }
 0x277   : > { %v2007_v34 = vpop.permute.xlu0 %2006 }
 0x278   : > { %v2016_v2 = vadd.f32 %v2007_v34, %v1992_v50 }
 0x279   : > { %v2057_v25 = vpop.permute.xlu1 %2056 }
 0x27a   : > { %v2065_v14 = vadd.f32 %v2057_v25, %v2041_v18 }
 0x27b   : > { %v2027_v29 = vpop.permute.xlu0 %2026 }
 0x27c   : > { %v2038_v36 = vadd.f32 %v2027_v29, %v2014_v52 }
 0x27d   : > { %v2077_v57 = vpop.permute.xlu1 %2076 }
 0x27e   : > { %v2087_v15 = vadd.f32 %v2077_v57, %v2063_v58 }
 0x27f   : > { %v2031_v5 = vpop.permute.xlu0 %2030 }
 0x280   : > { %v2040_v16 = vadd.f32 %v2031_v5, %v2016_v2 }
 0x281   : > { %v2081_v11 = vpop.permute.xlu1 %2080 }
 0x282   : > { %v2089_v23 = vadd.f32 %v2081_v11, %v2065_v14 }
 0x283   : > { %v2051_v9 = vpop.permute.xlu0 %2050 }
 0x284   : > { %v2062_v4 = vadd.f32 %v2051_v9, %v2038_v36 }
 0x285   : > { %v2101_v30 = vpop.permute.xlu1 %2100 }
 0x286   : > { %v2111_v46 = vadd.f32 %v2101_v30, %v2087_v15 }
 0x287   : > { %v2055_v53 = vpop.permute.xlu0 %2054 }
 0x288   : > { %v2064_v7 = vadd.f32 %v2055_v53, %v2040_v16 }
 0x289   : > { %v2105_v49 = vpop.permute.xlu1 %2104 }
 0x28a   : > { %v2113_v28 = vadd.f32 %v2105_v49, %v2089_v23 }
 0x28b   : > { %v2075_v44 = vpop.permute.xlu0 %2074 }
 0x28c   : > { %v2086_v6 = vadd.f32 %v2075_v44, %v2062_v4 }
 0x28d   : > { %v2125_v26 = vpop.permute.xlu1 %2124 }
 0x28e   : > { %v2135_v31 = vadd.f32 %v2125_v26, %v2111_v46 }
 0x28f   : > { %v2079_v0 = vpop.permute.xlu0 %2078 }
 0x290   : > { %v2088_v60 = vadd.f32 %v2079_v0, %v2064_v7 }
 0x291   : > { %v2129_v43 = vpop.permute.xlu1 %2128 }
 0x292   : > { %v2137_v40 = vadd.f32 %v2129_v43, %v2113_v28 }
 0x293   : > { %v2099_v24 = vpop.permute.xlu0 %2098 }
 0x294   : > { %v2110_v10 = vadd.f32 %v2099_v24, %v2086_v6 }
 0x295   : > { %v2149_v1 = vpop.permute.xlu1 %2148 }
 0x296   : > { %v2159_v17 = vadd.f32 %v2149_v1, %v2135_v31 }
 0x297   : > { %v2103_v39 = vpop.permute.xlu0 %2102 }
 0x298   : > { %v2112_v25 = vadd.f32 %v2103_v39, %v2088_v60 }
 0x299   : > { %v2153_v51 = vpop.permute.xlu1 %2152 }
 0x29a   : > { %v2161_v33 = vadd.f32 %v2153_v51, %v2137_v40 }
 0x29b   : > { %v2123_v61 = vpop.permute.xlu0 %2122 }
 0x29c   : > { %v2134_v34 = vadd.f32 %v2123_v61, %v2110_v10 }
 0x29d   : > { %v2173_v45 = vpop.permute.xlu1 %2172 }
 0x29e   : > { %v2183_v13 = vadd.f32 %v2173_v45, %v2159_v17 }
 0x29f   : > { %v2127_v32 = vpop.permute.xlu0 %2126 }
 0x2a0   : > { %v2136_v5 = vadd.f32 %v2127_v32, %v2112_v25 }
 0x2a1   : > { %v2177_v59 = vpop.permute.xlu1 %2176 }
 0x2a2   : > { %v2185_v21 = vadd.f32 %v2177_v59, %v2161_v33 }
 0x2a3   : > { %v2147_v22 = vpop.permute.xlu0 %2146 }
 0x2a4   : > { %v2158_v29 = vadd.f32 %v2147_v22, %v2134_v34 }
 0x2a5   : > { %v2197_v8 = vpop.permute.xlu1 %2196 }
 0x2a6   : > { %v2207_v63 = vadd.f32 %v2197_v8, %v2183_v13 }
 0x2a7   : > { %v2151_v47 = vpop.permute.xlu0 %2150 }
 0x2a8   : > { %v2160_v9 = vadd.f32 %v2151_v47, %v2136_v5 }
 0x2a9   : > { %v2201_v27 = vpop.permute.xlu1 %2200 }
 0x2aa   : > { %v2209_v62 = vadd.f32 %v2201_v27, %v2185_v21 }
 0x2ab   : > { %v2171_v20 = vpop.permute.xlu0 %2170 }
 0x2ac   : > { %v2182_v11 = vadd.f32 %v2171_v20, %v2158_v29 }
 0x2ad   : > { %v2221_v48 = vpop.permute.xlu1 %2220 }
 0x2ae   : > { %v2231_v56 = vadd.f32 %v2221_v48, %v2207_v63 }
 0x2af   : > { %v2175_v3 = vpop.permute.xlu0 %2174 }
 0x2b0   : > { %2236 = vst.msk [vmem:[%s255_s9 + $0x8] sm:$0xff] %vm2234_vm13, %v2231_v56  ;;  %v2184_v44 = vadd.f32 %v2175_v3, %v2160_v9 }
 0x2b1   : > { %v2225_v41 = vpop.permute.xlu1 %2224 }
 0x2b2   : > { %v2233_v12 = vadd.f32 %v2225_v41, %v2209_v62 }
 0x2b3   : > { %v2195_v35 = vpop.permute.xlu0 %2194 }
 0x2b4   : > { %2238 = vst.msk [vmem:[%s255_s9 + $0x18] sm:$0xff] %vm2234_vm13, %v2233_v12  ;;  %v2206_v30 = vadd.f32 %v2195_v35, %v2182_v11 }
 0x2b7   : > { %v2199_v57 = vpop.permute.xlu0 %2198 }
 0x2b8   : > { %v2208_v43 = vadd.f32 %v2199_v57, %v2184_v44 }
 0x2bb   : > { %v2219_v49 = vpop.permute.xlu0 %2218 }
 0x2bc   : > { %v2230_v26 = vadd.f32 %v2219_v49, %v2206_v30 }
 0x2be   : > { %2235 = vst.msk [vmem:[%s255_s9] sm:$0xff] %vm2234_vm13, %v2230_v26 }
 0x2bf   : > { %v2223_v53 = vpop.permute.xlu0 %2222 }
 0x2c0   : > { %v2232_v24 = vadd.f32 %v2223_v53, %v2208_v43 }
 0x2c2   : > { %2237 = vst.msk [vmem:[%s255_s9 + $0x10] sm:$0xff] %vm2234_vm13, %v2232_v24 }
 0x2c3 PF: > { %s13_s14 = sadd.s32 1, %s2446_s14   ;;  %s3796_s12 = smov %s2442_s13 }
 0x2c4   : > { %p10_p5 = scmp.ge.s32.totalorder %s13_s14, 4   ;;  %s3797_s13 = smov %s3799_s15 }
 0x2c6   :  { %12 = sbr.rel (!%p10_p5) target bundleno = 2 (0x2), region = 68 }

</bundles_post_ra>
